<compile_context>
chip_gen: v7x
topology: tpu7x:2x2x1
jax: 0.10.0
libtpu: 0.0.40
codegen_flags: <defaults>
</compile_context>

<pallas_src>
import numpy as np
import jax
import jax.numpy as jnp
from jax import lax
from jax.experimental import pallas as pl
from jax.experimental.pallas import tpu as pltpu

EPS = 1e-5


# --------------------------------------------------------------------------
# Kernel
# --------------------------------------------------------------------------
def _make_dcr_kernel(R, Wh, Kh, Cin, Cout, count, matmul_dtype):
    """Fused sub-pixel ConvTranspose + (split) BatchNorm + ReLU kernel.

    Grid = (pass, image, row_block):
      pass 0: accumulate global per-channel sum / sum-of-squares,
      pass 1: recompute the conv tile, normalize both halves, ReLU, store.
    """
    RW = R * Wh                      # half-res pixels per tile
    C4 = 4 * Cout                    # 4 phases x Cout conv channels

    def kernel(x1p_ref, wbig_ref, b4_ref, x2_ref,
               gcv_ref, bcv_ref, gx2_ref, bx2_ref,
               yconv_ref, yx2_ref,
               csum_ref, csq_ref, xsum_ref, xsq_ref):
        pass_id = pl.program_id(0)
        n_id = pl.program_id(1)
        ib = pl.program_id(2)

        # ---- sub-pixel (phase-decomposed) transposed conv ------------------
        # Window of padded input rows needed by this block of half-res rows.
        i0 = ib * R
        xwin = x1p_ref[0, pl.ds(i0, R + Kh - 1), :, :]      # (R+Kh-1, Wp, Cin)

        # im2col in VMEM: 9 (Kh*Kh) shifted windows -> one (RW, Kh*Kh*Cin)
        # patch matrix -> a single MXU matmul (contraction = Kh*Kh*Cin).
        pieces = []
        for da in range(Kh):
            for db in range(Kh):
                pieces.append(xwin[da:da + R, db:db + Wh, :].reshape(RW, Cin))
        patches = jnp.concatenate(pieces, axis=-1)           # (RW, Kh*Kh*Cin)

        conv = jnp.dot(patches.astype(matmul_dtype), wbig_ref[...],
                       preferred_element_type=jnp.float32)
        conv = conv + b4_ref[...]                            # (RW, 4*Cout) f32

        x2t = x2_ref[0, 0]                                   # (Cout, tile_mx), lane dense

        # ---- pass 0: accumulate global BN stats (sum & sum of squares) -----
        first_step = (pass_id == 0) & (n_id == 0) & (ib == 0)

        @pl.when(first_step)
        def _():
            csum_ref[...] = jnp.zeros_like(csum_ref)
            csq_ref[...] = jnp.zeros_like(csq_ref)
            xsum_ref[...] = jnp.zeros_like(xsum_ref)
            xsq_ref[...] = jnp.zeros_like(xsq_ref)

        @pl.when(pass_id == 0)
        def _():
            s16 = jnp.sum(conv, axis=0, keepdims=True)        # (1, 4*Cout)
            q16 = jnp.sum(conv * conv, axis=0, keepdims=True)
            # fold the 4 phase groups into per-BN-channel partial sums
            csum_ref[...] += (s16[:, 0:Cout] + s16[:, Cout:2 * Cout] +
                              s16[:, 2 * Cout:3 * Cout] + s16[:, 3 * Cout:4 * Cout])
            csq_ref[...] += (q16[:, 0:Cout] + q16[:, Cout:2 * Cout] +
                             q16[:, 2 * Cout:3 * Cout] + q16[:, 3 * Cout:4 * Cout])
            xsum_ref[...] += jnp.sum(x2t, axis=1, keepdims=True)       # (Cout, 1)
            xsq_ref[...] += jnp.sum(x2t * x2t, axis=1, keepdims=True)

        # ---- pass 1: normalize + ReLU + store -------------------------------
        @pl.when(pass_id == 1)
        def _():
            inv_cnt = 1.0 / count
            # conv half (training-mode BN, biased variance)
            cmean = csum_ref[...] * inv_cnt                   # (1, Cout)
            cvar = csq_ref[...] * inv_cnt - cmean * cmean
            cscale = gcv_ref[...] * lax.rsqrt(cvar + EPS)
            cshift = bcv_ref[...] - cmean * cscale
            cscale4 = jnp.concatenate([cscale] * 4, axis=1)   # (1, 4*Cout)
            cshift4 = jnp.concatenate([cshift] * 4, axis=1)
            yconv_ref[0, 0] = jnp.maximum(conv * cscale4 + cshift4, 0.0)

            # x2 half (lane-dense load, lane-dense store)
            xmean = xsum_ref[...] * inv_cnt                   # (Cout, 1)
            xvar = xsq_ref[...] * inv_cnt - xmean * xmean
            xscale = gx2_ref[...] * lax.rsqrt(xvar + EPS)
            xshift = bx2_ref[...] - xmean * xscale
            yx2_ref[0, 0] = jnp.maximum(x2t * xscale + xshift, 0.0)

    return kernel


# --------------------------------------------------------------------------
# Wrapper
# --------------------------------------------------------------------------
def _pick_rows_per_block(Hh, Wh, max_px=4096):
    best = 1
    for r in range(1, Hh + 1):
        if Hh % r == 0 and r * Wh <= max_px:
            best = r
    return best


def dcr_forward(x1, x2, w, b, gamma, beta, *, kernel_size, stride=2, padding=2,
                output_padding=0, rows_per_block=None, matmul_dtype=jnp.float32):
    """x1: (N,Cin,H,W), x2: (N,Cout,Ho,Wo) NCHW.  Returns (N,2*Cout,Ho,Wo)."""
    N, Cin, H, W = x1.shape
    Cout = w.shape[1]
    K = kernel_size
    assert stride == 2 and padding == 2, "DCR uses stride=2, padding=2"
    assert K % 2 == 0 and K >= 4, "phase decomposition needs even kernel_size >= 4"
    # TODO(synk): output_padding > 0 gives an odd output size (unequal phases)
    # and is not supported by the phase-decomposed kernel.
    assert output_padding == 0

    Ho = (H - 1) * stride - 2 * padding + K + output_padding
    Wo = (W - 1) * stride - 2 * padding + K + output_padding
    assert x2.shape == (N, Cout, Ho, Wo)

    Kh = K // 2                      # taps per phase, per spatial dim
    Hh, Wh = Ho // 2, Wo // 2        # half-resolution (phase-grid) size
    pad_s = Kh - 2                   # spatial padding of x1 for the phase conv
    Hp, Wp = H + 2 * pad_s, W + 2 * pad_s
    assert Hp == Hh + Kh - 1 and Wp == Wh + Kh - 1

    # ---- glue: pad x1 (NHWC).  NO zero-dilated buffer is built. -------------
    x1_nhwc = jnp.transpose(x1, (0, 2, 3, 1)).astype(jnp.float32)
    x1p = jnp.pad(x1_nhwc, ((0, 0), (pad_s, pad_s), (pad_s, pad_s), (0, 0)))

    # ---- sub-pixel weight repack: one dense (Kh*Kh*Cin, 4*Cout) matrix ------
    # Wbig[(da*Kh+db)*Cin+ci, (r*2+s)*Cout+co] = w[ci, co, K-2-2*da+r, K-2-2*db+s]
    da = np.arange(Kh)
    rr = np.arange(2)
    ktap = K - 2 - 2 * da[:, None] + rr[None, :]              # (Kh, 2)
    wsub = jnp.asarray(w, jnp.float32)[:, :, ktap[:, :, None, None],
                                       ktap[None, None, :, :]]
    wbig = jnp.transpose(wsub, (2, 4, 0, 3, 5, 1)).reshape(Kh * Kh * Cin, 4 * Cout)
    wbig = wbig.astype(matmul_dtype)  # bf16 MXU path optional; accum stays f32

    b4 = jnp.tile(jnp.asarray(b, jnp.float32), 4).reshape(1, 4 * Cout)
    gamma = jnp.asarray(gamma, jnp.float32)
    beta = jnp.asarray(beta, jnp.float32)
    gcv = gamma[:Cout].reshape(1, Cout)
    bcv = beta[:Cout].reshape(1, Cout)
    gx2 = gamma[Cout:].reshape(Cout, 1)
    bx2 = beta[Cout:].reshape(Cout, 1)

    # ---- tiling -------------------------------------------------------------
    R = rows_per_block if rows_per_block is not None else _pick_rows_per_block(Hh, Wh)
    assert Hh % R == 0, "rows_per_block must divide the half-resolution height"
    n_rb = Hh // R
    RW = R * Wh
    tile_mx = (Ho * Wo) // n_rb

    # x2 fed lane-dense: (N, n_rb, Cout, tile_mx) is a pure reshape of NCHW
    x2r = jnp.asarray(x2, jnp.float32).reshape(N, Cout, n_rb, tile_mx) \
                                      .transpose(0, 2, 1, 3)

    kern = _make_dcr_kernel(R, Wh, Kh, Cin, Cout, float(N * Ho * Wo), matmul_dtype)

    grid = (2, N, n_rb)              # (pass, image, row-block)
    in_specs = [
        pl.BlockSpec((1, Hp, Wp, Cin), lambda p, n, i: (n, 0, 0, 0)),       # x1p
        pl.BlockSpec((Kh * Kh * Cin, 4 * Cout), lambda p, n, i: (0, 0)),    # wbig
        pl.BlockSpec((1, 4 * Cout), lambda p, n, i: (0, 0)),                # b4
        pl.BlockSpec((1, 1, Cout, tile_mx), lambda p, n, i: (n, i, 0, 0)),  # x2
        pl.BlockSpec((1, Cout), lambda p, n, i: (0, 0)),                    # gamma conv
        pl.BlockSpec((1, Cout), lambda p, n, i: (0, 0)),                    # beta  conv
        pl.BlockSpec((Cout, 1), lambda p, n, i: (0, 0)),                    # gamma x2
        pl.BlockSpec((Cout, 1), lambda p, n, i: (0, 0)),                    # beta  x2
    ]
    out_specs = (
        pl.BlockSpec((1, 1, RW, 4 * Cout), lambda p, n, i: (n, i, 0, 0)),   # conv half
        pl.BlockSpec((1, 1, Cout, tile_mx), lambda p, n, i: (n, i, 0, 0)),  # x2 half
    )
    out_shape = (
        jax.ShapeDtypeStruct((N, n_rb, RW, 4 * Cout), jnp.float32),
        jax.ShapeDtypeStruct((N, n_rb, Cout, tile_mx), jnp.float32),
    )
    scratch_shapes = [
        pltpu.VMEM((1, Cout), jnp.float32),   # conv sum
        pltpu.VMEM((1, Cout), jnp.float32),   # conv sum of squares
        pltpu.VMEM((Cout, 1), jnp.float32),   # x2 sum
        pltpu.VMEM((Cout, 1), jnp.float32),   # x2 sum of squares
    ]

    y_conv, y_x2 = pl.pallas_call(
        kern,
        grid=grid,
        in_specs=in_specs,
        out_specs=out_specs,
        out_shape=out_shape,
        scratch_shapes=scratch_shapes,
        compiler_params=pltpu.CompilerParams(
            # global BN reduction + two-pass structure => all axes sequential.
            # TODO(synk): v7x dual-core split would need per-core partial
            # stats combined via CMEM/second pass.
            dimension_semantics=("arbitrary", "arbitrary", "arbitrary"),
            vmem_limit_bytes=32 * 1024 * 1024),
    )(x1p, wbig, b4, x2r, gcv, bcv, gx2, bx2)

    # ---- cheap XLA-side relayout back to NCHW + channel concat --------------
    yc = y_conv.reshape(N, n_rb, R, Wh, 2, 2, Cout)      # (n, ib, rl, j, r, s, co)
    yc = yc.transpose(0, 6, 1, 2, 4, 3, 5).reshape(N, Cout, Ho, Wo)
    yx = y_x2.transpose(0, 2, 1, 3).reshape(N, Cout, Ho, Wo)
    return jnp.concatenate([yc, yx], axis=1)


# --------------------------------------------------------------------------
# Pure-JAX reference of the PyTorch forward (training-mode BatchNorm)
# --------------------------------------------------------------------------
def dcr_reference(x1, x2, w, b, gamma, beta, *, kernel_size, stride=2,
                  padding=2, output_padding=0):
    K = kernel_size
    w_oihw = jnp.transpose(w, (1, 0, 2, 3))[:, :, ::-1, ::-1]
    conv = lax.conv_general_dilated(
        x1, w_oihw, window_strides=(1, 1),
        padding=[(K - 1 - padding, K - 1 - padding + output_padding)] * 2,
        lhs_dilation=(stride, stride),
        dimension_numbers=('NCHW', 'OIHW', 'NCHW'))
    conv = conv + b[None, :, None, None]
    cat = jnp.concatenate([conv, x2], axis=1)
    mean = cat.mean(axis=(0, 2, 3), keepdims=True)
    var = ((cat - mean) ** 2).mean(axis=(0, 2, 3), keepdims=True)
    y = (cat - mean) / jnp.sqrt(var + EPS)
    y = y * gamma[None, :, None, None] + beta[None, :, None, None]
    return jnp.maximum(y, 0.0)


# --------------------------------------------------------------------------
if __name__ == "__main__":
    key = jax.random.PRNGKey(0)

    # TODO(synk): BatchNorm running-stat (running_mean/var) buffer updates are
    # a training-time side effect and are not modeled; the forward output does
    # not depend on them.
    configs = [
        # multi-tile grid (2 images x 4 row blocks), f32 MXU
        dict(N=2, Cin=4, Cout=4, H=16, W=16, K=6, rows_per_block=4,
             matmul_dtype=jnp.float32, tol=1e-4),
        # single tile per image, bf16 MXU path (f32 accumulation / BN math)
        dict(N=2, Cin=4, Cout=4, H=16, W=16, K=6, rows_per_block=None,
             matmul_dtype=jnp.bfloat16, tol=3e-2),
        # different kernel size / channel count / odd spatial size
        dict(N=2, Cin=8, Cout=4, H=12, W=12, K=4, rows_per_block=None,
             matmul_dtype=jnp.float32, tol=1e-4),
    ]

    for cfg in configs:
        key, k1, k2, k3, k4, k5, k6 = jax.random.split(key, 7)
        N, Cin, Cout = cfg["N"], cfg["Cin"], cfg["Cout"]
        H, W, K = cfg["H"], cfg["W"], cfg["K"]
        stride, pad, out_pad = 2, 2, 0
        Ho = (H - 1) * stride - 2 * pad + K + out_pad
        Wo = (W - 1) * stride - 2 * pad + K + out_pad

        x1 = jax.random.normal(k1, (N, Cin, H, W), jnp.float32)
        x2 = jax.random.normal(k2, (N, Cout, Ho, Wo), jnp.float32)
        w = jax.random.normal(k3, (Cin, Cout, K, K), jnp.float32) * 0.1
        b = jax.random.normal(k4, (Cout,), jnp.float32) * 0.1
        gamma = jax.random.uniform(k5, (2 * Cout,), jnp.float32, 0.5, 1.5)
        beta = jax.random.normal(k6, (2 * Cout,), jnp.float32) * 0.1

        out = dcr_forward(x1, x2, w, b, gamma, beta,
                          kernel_size=K, stride=stride, padding=pad,
                          output_padding=out_pad,
                          rows_per_block=cfg["rows_per_block"],
                          matmul_dtype=cfg["matmul_dtype"])
        jax.block_until_ready(out)

        ref = dcr_reference(x1, x2, w, b, gamma, beta,
                            kernel_size=K, stride=stride, padding=pad,
                            output_padding=out_pad)
        np.testing.assert_allclose(np.asarray(out), np.asarray(ref),
                                   rtol=cfg["tol"], atol=cfg["tol"])

    print("KERNEL_OK")
</pallas_src>

<mosaic_0001>
module attributes {stable_mosaic.version = 11 : i64} {
  func.func @kernel(%arg0: i32, %arg1: i32, %arg2: i32, %arg3: memref<1x18x18x4xf32, #tpu.memory_space<vmem>>, %arg4: memref<36x16xf32, #tpu.memory_space<vmem>>, %arg5: memref<1x16xf32, #tpu.memory_space<vmem>>, %arg6: memref<1x1x4x256xf32, #tpu.memory_space<vmem>>, %arg7: memref<1x4xf32, #tpu.memory_space<vmem>>, %arg8: memref<1x4xf32, #tpu.memory_space<vmem>>, %arg9: memref<4x1xf32, #tpu.memory_space<vmem>>, %arg10: memref<4x1xf32, #tpu.memory_space<vmem>>, %arg11: memref<1x1x64x16xf32, #tpu.memory_space<vmem>>, %arg12: memref<1x1x4x256xf32, #tpu.memory_space<vmem>>, %arg13: memref<1x4xf32, #tpu.memory_space<vmem>>, %arg14: memref<1x4xf32, #tpu.memory_space<vmem>>, %arg15: memref<4x1xf32, #tpu.memory_space<vmem>>, %arg16: memref<4x1xf32, #tpu.memory_space<vmem>>) attributes {dimension_semantics = [#tpu.dimension_semantics<arbitrary>, #tpu.dimension_semantics<arbitrary>, #tpu.dimension_semantics<arbitrary>], iteration_bounds = array<i64: 2, 2, 4>, scalar_prefetch = 0 : i64, scratch_operands = 4 : i64, tpu.core_type = #tpu.core_type<tc>, window_params = [{transform_indices = @transform_0, window_bounds = array<i64: 1, 18, 18, 4>}, {pipeline_mode = #tpu.pipeline_mode<synchronous>, transform_indices = @transform_1, window_bounds = array<i64: 36, 16>}, {pipeline_mode = #tpu.pipeline_mode<synchronous>, transform_indices = @transform_2, window_bounds = array<i64: 1, 16>}, {transform_indices = @transform_3, window_bounds = array<i64: 1, 1, 4, 256>}, {pipeline_mode = #tpu.pipeline_mode<synchronous>, transform_indices = @transform_4, window_bounds = array<i64: 1, 4>}, {pipeline_mode = #tpu.pipeline_mode<synchronous>, transform_indices = @transform_5, window_bounds = array<i64: 1, 4>}, {pipeline_mode = #tpu.pipeline_mode<synchronous>, transform_indices = @transform_6, window_bounds = array<i64: 4, 1>}, {pipeline_mode = #tpu.pipeline_mode<synchronous>, transform_indices = @transform_7, window_bounds = array<i64: 4, 1>}, {transform_indices = @transform_8, window_bounds = array<i64: 1, 1, 64, 16>}, {transform_indices = @transform_9, window_bounds = array<i64: 1, 1, 4, 256>}]} {
    %c4_i32 = arith.constant 4 : i32
    %0 = arith.muli %arg2, %c4_i32 : i32
    %c0 = arith.constant 0 : index
    %1 = arith.index_cast %0 : i32 to index
    %c0_0 = arith.constant 0 : index
    %c0_1 = arith.constant 0 : index
    %2 = vector.load %arg3[%c0, %1, %c0_0, %c0_1] : memref<1x18x18x4xf32, #tpu.memory_space<vmem>>, vector<1x6x18x4xf32>
    %3 = vector.shape_cast %2 : vector<1x6x18x4xf32> to vector<6x18x4xf32>
    %4 = vector.extract_strided_slice %3 {offsets = [0, 0, 0], sizes = [4, 16, 4], strides = [1, 1, 1]} : vector<6x18x4xf32> to vector<4x16x4xf32>
    %5 = vector.shape_cast %4 : vector<4x16x4xf32> to vector<64x4xf32>
    %6 = vector.extract_strided_slice %3 {offsets = [0, 1, 0], sizes = [4, 16, 4], strides = [1, 1, 1]} : vector<6x18x4xf32> to vector<4x16x4xf32>
    %7 = vector.shape_cast %6 : vector<4x16x4xf32> to vector<64x4xf32>
    %8 = vector.extract_strided_slice %3 {offsets = [0, 2, 0], sizes = [4, 16, 4], strides = [1, 1, 1]} : vector<6x18x4xf32> to vector<4x16x4xf32>
    %9 = vector.shape_cast %8 : vector<4x16x4xf32> to vector<64x4xf32>
    %10 = vector.extract_strided_slice %3 {offsets = [1, 0, 0], sizes = [4, 16, 4], strides = [1, 1, 1]} : vector<6x18x4xf32> to vector<4x16x4xf32>
    %11 = vector.shape_cast %10 : vector<4x16x4xf32> to vector<64x4xf32>
    %12 = vector.extract_strided_slice %3 {offsets = [1, 1, 0], sizes = [4, 16, 4], strides = [1, 1, 1]} : vector<6x18x4xf32> to vector<4x16x4xf32>
    %13 = vector.shape_cast %12 : vector<4x16x4xf32> to vector<64x4xf32>
    %14 = vector.extract_strided_slice %3 {offsets = [1, 2, 0], sizes = [4, 16, 4], strides = [1, 1, 1]} : vector<6x18x4xf32> to vector<4x16x4xf32>
    %15 = vector.shape_cast %14 : vector<4x16x4xf32> to vector<64x4xf32>
    %16 = vector.extract_strided_slice %3 {offsets = [2, 0, 0], sizes = [4, 16, 4], strides = [1, 1, 1]} : vector<6x18x4xf32> to vector<4x16x4xf32>
    %17 = vector.shape_cast %16 : vector<4x16x4xf32> to vector<64x4xf32>
    %18 = vector.extract_strided_slice %3 {offsets = [2, 1, 0], sizes = [4, 16, 4], strides = [1, 1, 1]} : vector<6x18x4xf32> to vector<4x16x4xf32>
    %19 = vector.shape_cast %18 : vector<4x16x4xf32> to vector<64x4xf32>
    %20 = vector.extract_strided_slice %3 {offsets = [2, 2, 0], sizes = [4, 16, 4], strides = [1, 1, 1]} : vector<6x18x4xf32> to vector<4x16x4xf32>
    %21 = vector.shape_cast %20 : vector<4x16x4xf32> to vector<64x4xf32>
    %22 = tpu.concatenate %5, %7, %9, %11, %13, %15, %17, %19, %21 in 1 : vector<64x4xf32>, vector<64x4xf32>, vector<64x4xf32>, vector<64x4xf32>, vector<64x4xf32>, vector<64x4xf32>, vector<64x4xf32>, vector<64x4xf32>, vector<64x4xf32> -> vector<64x36xf32>
    %c0_2 = arith.constant 0 : index
    %c0_3 = arith.constant 0 : index
    %23 = vector.load %arg4[%c0_2, %c0_3] : memref<36x16xf32, #tpu.memory_space<vmem>>, vector<36x16xf32>
    %cst = arith.constant dense<0.000000e+00> : vector<64x16xf32>
    %24 = tpu.matmul %22, %23, %cst {dimension_numbers = #tpu.dot_dimension_numbers<[1], [0], [0], [1], [0, 0, 1, 1], [], []>} : vector<64x36xf32>, vector<36x16xf32>, vector<64x16xf32> -> vector<64x16xf32>
    %c0_4 = arith.constant 0 : index
    %c0_5 = arith.constant 0 : index
    %25 = vector.load %arg5[%c0_4, %c0_5] : memref<1x16xf32, #tpu.memory_space<vmem>>, vector<1x16xf32>
    %26 = vector.broadcast %25 : vector<1x16xf32> to vector<64x16xf32>
    %27 = arith.addf %24, %26 : vector<64x16xf32>
    %c0_6 = arith.constant 0 : index
    %c0_7 = arith.constant 0 : index
    %c0_8 = arith.constant 0 : index
    %c0_9 = arith.constant 0 : index
    %28 = vector.load %arg6[%c0_6, %c0_7, %c0_8, %c0_9] : memref<1x1x4x256xf32, #tpu.memory_space<vmem>>, vector<1x1x4x256xf32>
    %29 = vector.shape_cast %28 : vector<1x1x4x256xf32> to vector<4x256xf32>
    %c0_i32 = arith.constant 0 : i32
    %30 = arith.cmpi eq, %arg0, %c0_i32 : i32
    %c0_i32_10 = arith.constant 0 : i32
    %31 = arith.cmpi eq, %arg1, %c0_i32_10 : i32
    %32 = arith.andi %30, %31 : i1
    %c0_i32_11 = arith.constant 0 : i32
    %33 = arith.cmpi eq, %arg2, %c0_i32_11 : i32
    %34 = arith.andi %32, %33 : i1
    %35 = arith.extui %34 : i1 to i32
    %c0_i32_12 = arith.constant 0 : i32
    %36 = arith.cmpi ne, %35, %c0_i32_12 : i32
    scf.if %36 {
      %cst_16 = arith.constant 0.000000e+00 : f32
      %43 = vector.broadcast %cst_16 : f32 to vector<1x4xf32>
      %c0_17 = arith.constant 0 : index
      %c0_18 = arith.constant 0 : index
      %44 = vector.load %arg13[%c0_17, %c0_18] : memref<1x4xf32, #tpu.memory_space<vmem>>, vector<1x4xf32>
      tpu.vector_store %arg13[%c0_17, %c0_18], %43 {strides = array<i32>} : memref<1x4xf32, #tpu.memory_space<vmem>>, vector<1x4xf32>,
      %cst_19 = arith.constant 0.000000e+00 : f32
      %45 = vector.broadcast %cst_19 : f32 to vector<1x4xf32>
      %c0_20 = arith.constant 0 : index
      %c0_21 = arith.constant 0 : index
      %46 = vector.load %arg14[%c0_20, %c0_21] : memref<1x4xf32, #tpu.memory_space<vmem>>, vector<1x4xf32>
      tpu.vector_store %arg14[%c0_20, %c0_21], %45 {strides = array<i32>} : memref<1x4xf32, #tpu.memory_space<vmem>>, vector<1x4xf32>,
      %cst_22 = arith.constant 0.000000e+00 : f32
      %47 = vector.broadcast %cst_22 : f32 to vector<4x1xf32>
      %c0_23 = arith.constant 0 : index
      %c0_24 = arith.constant 0 : index
      %48 = vector.load %arg15[%c0_23, %c0_24] : memref<4x1xf32, #tpu.memory_space<vmem>>, vector<4x1xf32>
      tpu.vector_store %arg15[%c0_23, %c0_24], %47 {strides = array<i32>} : memref<4x1xf32, #tpu.memory_space<vmem>>, vector<4x1xf32>,
      %cst_25 = arith.constant 0.000000e+00 : f32
      %49 = vector.broadcast %cst_25 : f32 to vector<4x1xf32>
      %c0_26 = arith.constant 0 : index
      %c0_27 = arith.constant 0 : index
      %50 = vector.load %arg16[%c0_26, %c0_27] : memref<4x1xf32, #tpu.memory_space<vmem>>, vector<4x1xf32>
      tpu.vector_store %arg16[%c0_26, %c0_27], %49 {strides = array<i32>} : memref<4x1xf32, #tpu.memory_space<vmem>>, vector<4x1xf32>,
    } else {
    }
    %c0_i32_13 = arith.constant 0 : i32
    %37 = arith.cmpi eq, %arg0, %c0_i32_13 : i32
    %38 = arith.extui %37 : i1 to i32
    %c0_i32_14 = arith.constant 0 : i32
    %39 = arith.cmpi ne, %38, %c0_i32_14 : i32
    scf.if %39 {
      %cst_16 = arith.constant dense<0.000000e+00> : vector<16xf32>
      %43 = vector.multi_reduction <add>, %27, %cst_16 [0] : vector<64x16xf32> to vector<16xf32>
      %44 = vector.shape_cast %43 : vector<16xf32> to vector<1x16xf32>
      %45 = arith.mulf %27, %27 : vector<64x16xf32>
      %cst_17 = arith.constant dense<0.000000e+00> : vector<16xf32>
      %46 = vector.multi_reduction <add>, %45, %cst_17 [0] : vector<64x16xf32> to vector<16xf32>
      %47 = vector.shape_cast %46 : vector<16xf32> to vector<1x16xf32>
      %c0_18 = arith.constant 0 : index
      %c0_19 = arith.constant 0 : index
      %48 = vector.load %arg13[%c0_18, %c0_19] : memref<1x4xf32, #tpu.memory_space<vmem>>, vector<1x4xf32>
      %49 = vector.extract_strided_slice %44 {offsets = [0, 0], sizes = [1, 4], strides = [1, 1]} : vector<1x16xf32> to vector<1x4xf32>
      %50 = vector.extract_strided_slice %44 {offsets = [0, 4], sizes = [1, 4], strides = [1, 1]} : vector<1x16xf32> to vector<1x4xf32>
      %51 = arith.addf %49, %50 : vector<1x4xf32>
      %52 = vector.extract_strided_slice %44 {offsets = [0, 8], sizes = [1, 4], strides = [1, 1]} : vector<1x16xf32> to vector<1x4xf32>
      %53 = arith.addf %51, %52 : vector<1x4xf32>
      %54 = vector.extract_strided_slice %44 {offsets = [0, 12], sizes = [1, 4], strides = [1, 1]} : vector<1x16xf32> to vector<1x4xf32>
      %55 = arith.addf %53, %54 : vector<1x4xf32>
      %56 = arith.addf %48, %55 : vector<1x4xf32>
      %c0_20 = arith.constant 0 : index
      %c0_21 = arith.constant 0 : index
      %57 = vector.load %arg13[%c0_20, %c0_21] : memref<1x4xf32, #tpu.memory_space<vmem>>, vector<1x4xf32>
      tpu.vector_store %arg13[%c0_20, %c0_21], %56 {strides = array<i32>} : memref<1x4xf32, #tpu.memory_space<vmem>>, vector<1x4xf32>,
      %c0_22 = arith.constant 0 : index
      %c0_23 = arith.constant 0 : index
      %58 = vector.load %arg14[%c0_22, %c0_23] : memref<1x4xf32, #tpu.memory_space<vmem>>, vector<1x4xf32>
      %59 = vector.extract_strided_slice %47 {offsets = [0, 0], sizes = [1, 4], strides = [1, 1]} : vector<1x16xf32> to vector<1x4xf32>
      %60 = vector.extract_strided_slice %47 {offsets = [0, 4], sizes = [1, 4], strides = [1, 1]} : vector<1x16xf32> to vector<1x4xf32>
      %61 = arith.addf %59, %60 : vector<1x4xf32>
      %62 = vector.extract_strided_slice %47 {offsets = [0, 8], sizes = [1, 4], strides = [1, 1]} : vector<1x16xf32> to vector<1x4xf32>
      %63 = arith.addf %61, %62 : vector<1x4xf32>
      %64 = vector.extract_strided_slice %47 {offsets = [0, 12], sizes = [1, 4], strides = [1, 1]} : vector<1x16xf32> to vector<1x4xf32>
      %65 = arith.addf %63, %64 : vector<1x4xf32>
      %66 = arith.addf %58, %65 : vector<1x4xf32>
      %c0_24 = arith.constant 0 : index
      %c0_25 = arith.constant 0 : index
      %67 = vector.load %arg14[%c0_24, %c0_25] : memref<1x4xf32, #tpu.memory_space<vmem>>, vector<1x4xf32>
      tpu.vector_store %arg14[%c0_24, %c0_25], %66 {strides = array<i32>} : memref<1x4xf32, #tpu.memory_space<vmem>>, vector<1x4xf32>,
      %c0_26 = arith.constant 0 : index
      %c0_27 = arith.constant 0 : index
      %68 = vector.load %arg15[%c0_26, %c0_27] : memref<4x1xf32, #tpu.memory_space<vmem>>, vector<4x1xf32>
      %cst_28 = arith.constant dense<0.000000e+00> : vector<4xf32>
      %69 = vector.multi_reduction <add>, %29, %cst_28 [1] : vector<4x256xf32> to vector<4xf32>
      %70 = vector.shape_cast %69 : vector<4xf32> to vector<4x1xf32>
      %71 = arith.addf %68, %70 : vector<4x1xf32>
      %c0_29 = arith.constant 0 : index
      %c0_30 = arith.constant 0 : index
      %72 = vector.load %arg15[%c0_29, %c0_30] : memref<4x1xf32, #tpu.memory_space<vmem>>, vector<4x1xf32>
      tpu.vector_store %arg15[%c0_29, %c0_30], %71 {strides = array<i32>} : memref<4x1xf32, #tpu.memory_space<vmem>>, vector<4x1xf32>,
      %c0_31 = arith.constant 0 : index
      %c0_32 = arith.constant 0 : index
      %73 = vector.load %arg16[%c0_31, %c0_32] : memref<4x1xf32, #tpu.memory_space<vmem>>, vector<4x1xf32>
      %74 = arith.mulf %29, %29 : vector<4x256xf32>
      %cst_33 = arith.constant dense<0.000000e+00> : vector<4xf32>
      %75 = vector.multi_reduction <add>, %74, %cst_33 [1] : vector<4x256xf32> to vector<4xf32>
      %76 = vector.shape_cast %75 : vector<4xf32> to vector<4x1xf32>
      %77 = arith.addf %73, %76 : vector<4x1xf32>
      %c0_34 = arith.constant 0 : index
      %c0_35 = arith.constant 0 : index
      %78 = vector.load %arg16[%c0_34, %c0_35] : memref<4x1xf32, #tpu.memory_space<vmem>>, vector<4x1xf32>
      tpu.vector_store %arg16[%c0_34, %c0_35], %77 {strides = array<i32>} : memref<4x1xf32, #tpu.memory_space<vmem>>, vector<4x1xf32>,
    } else {
    }
    %c1_i32 = arith.constant 1 : i32
    %40 = arith.cmpi eq, %arg0, %c1_i32 : i32
    %41 = arith.extui %40 : i1 to i32
    %c0_i32_15 = arith.constant 0 : i32
    %42 = arith.cmpi ne, %41, %c0_i32_15 : i32
    scf.if %42 {
      %c0_16 = arith.constant 0 : index
      %c0_17 = arith.constant 0 : index
      %43 = vector.load %arg13[%c0_16, %c0_17] : memref<1x4xf32, #tpu.memory_space<vmem>>, vector<1x4xf32>
      %cst_18 = arith.constant 4.8828125E-4 : f32
      %44 = vector.broadcast %cst_18 : f32 to vector<1x4xf32>
      %45 = arith.mulf %43, %44 : vector<1x4xf32>
      %c0_19 = arith.constant 0 : index
      %c0_20 = arith.constant 0 : index
      %46 = vector.load %arg14[%c0_19, %c0_20] : memref<1x4xf32, #tpu.memory_space<vmem>>, vector<1x4xf32>
      %cst_21 = arith.constant 4.8828125E-4 : f32
      %47 = vector.broadcast %cst_21 : f32 to vector<1x4xf32>
      %48 = arith.mulf %46, %47 : vector<1x4xf32>
      %49 = arith.mulf %45, %45 : vector<1x4xf32>
      %50 = arith.subf %48, %49 : vector<1x4xf32>
      %c0_22 = arith.constant 0 : index
      %c0_23 = arith.constant 0 : index
      %51 = vector.load %arg7[%c0_22, %c0_23] : memref<1x4xf32, #tpu.memory_space<vmem>>, vector<1x4xf32>
      %cst_24 = arith.constant 9.99999974E-6 : f32
      %52 = vector.broadcast %cst_24 : f32 to vector<1x4xf32>
      %53 = arith.addf %50, %52 : vector<1x4xf32>
      %54 = math.rsqrt %53 : vector<1x4xf32>
      %55 = arith.mulf %51, %54 : vector<1x4xf32>
      %c0_25 = arith.constant 0 : index
      %c0_26 = arith.constant 0 : index
      %56 = vector.load %arg8[%c0_25, %c0_26] : memref<1x4xf32, #tpu.memory_space<vmem>>, vector<1x4xf32>
      %57 = arith.mulf %45, %55 : vector<1x4xf32>
      %58 = arith.subf %56, %57 : vector<1x4xf32>
      %59 = tpu.concatenate %55, %55, %55, %55 in 1 : vector<1x4xf32>, vector<1x4xf32>, vector<1x4xf32>, vector<1x4xf32> -> vector<1x16xf32>
      %60 = tpu.concatenate %58, %58, %58, %58 in 1 : vector<1x4xf32>, vector<1x4xf32>, vector<1x4xf32>, vector<1x4xf32> -> vector<1x16xf32>
      %61 = vector.broadcast %59 : vector<1x16xf32> to vector<64x16xf32>
      %62 = arith.mulf %27, %61 : vector<64x16xf32>
      %63 = vector.broadcast %60 : vector<1x16xf32> to vector<64x16xf32>
      %64 = arith.addf %62, %63 : vector<64x16xf32>
      %cst_27 = arith.constant 0.000000e+00 : f32
      %65 = vector.broadcast %cst_27 : f32 to vector<64x16xf32>
      %66 = arith.maximumf %64, %65 : vector<64x16xf32>
      %c0_28 = arith.constant 0 : index
      %c0_29 = arith.constant 0 : index
      %c0_30 = arith.constant 0 : index
      %c0_31 = arith.constant 0 : index
      %67 = vector.load %arg11[%c0_28, %c0_29, %c0_30, %c0_31] : memref<1x1x64x16xf32, #tpu.memory_space<vmem>>, vector<1x1x64x16xf32>
      %68 = vector.shape_cast %67 : vector<1x1x64x16xf32> to vector<64x16xf32>
      %69 = vector.shape_cast %66 : vector<64x16xf32> to vector<1x1x64x16xf32>
      tpu.vector_store %arg11[%c0_28, %c0_29, %c0_30, %c0_31], %69 {strides = array<i32>} : memref<1x1x64x16xf32, #tpu.memory_space<vmem>>, vector<1x1x64x16xf32>,
      %c0_32 = arith.constant 0 : index
      %c0_33 = arith.constant 0 : index
      %70 = vector.load %arg15[%c0_32, %c0_33] : memref<4x1xf32, #tpu.memory_space<vmem>>, vector<4x1xf32>
      %cst_34 = arith.constant 4.8828125E-4 : f32
      %71 = vector.broadcast %cst_34 : f32 to vector<4x1xf32>
      %72 = arith.mulf %70, %71 : vector<4x1xf32>
      %c0_35 = arith.constant 0 : index
      %c0_36 = arith.constant 0 : index
      %73 = vector.load %arg16[%c0_35, %c0_36] : memref<4x1xf32, #tpu.memory_space<vmem>>, vector<4x1xf32>
      %cst_37 = arith.constant 4.8828125E-4 : f32
      %74 = vector.broadcast %cst_37 : f32 to vector<4x1xf32>
      %75 = arith.mulf %73, %74 : vector<4x1xf32>
      %76 = arith.mulf %72, %72 : vector<4x1xf32>
      %77 = arith.subf %75, %76 : vector<4x1xf32>
      %c0_38 = arith.constant 0 : index
      %c0_39 = arith.constant 0 : index
      %78 = vector.load %arg9[%c0_38, %c0_39] : memref<4x1xf32, #tpu.memory_space<vmem>>, vector<4x1xf32>
      %cst_40 = arith.constant 9.99999974E-6 : f32
      %79 = vector.broadcast %cst_40 : f32 to vector<4x1xf32>
      %80 = arith.addf %77, %79 : vector<4x1xf32>
      %81 = math.rsqrt %80 : vector<4x1xf32>
      %82 = arith.mulf %78, %81 : vector<4x1xf32>
      %c0_41 = arith.constant 0 : index
      %c0_42 = arith.constant 0 : index
      %83 = vector.load %arg10[%c0_41, %c0_42] : memref<4x1xf32, #tpu.memory_space<vmem>>, vector<4x1xf32>
      %84 = arith.mulf %72, %82 : vector<4x1xf32>
      %85 = arith.subf %83, %84 : vector<4x1xf32>
      %86 = vector.broadcast %82 : vector<4x1xf32> to vector<4x256xf32>
      %87 = arith.mulf %29, %86 : vector<4x256xf32>
      %88 = vector.broadcast %85 : vector<4x1xf32> to vector<4x256xf32>
      %89 = arith.addf %87, %88 : vector<4x256xf32>
      %cst_43 = arith.constant 0.000000e+00 : f32
      %90 = vector.broadcast %cst_43 : f32 to vector<4x256xf32>
      %91 = arith.maximumf %89, %90 : vector<4x256xf32>
      %c0_44 = arith.constant 0 : index
      %c0_45 = arith.constant 0 : index
      %c0_46 = arith.constant 0 : index
      %c0_47 = arith.constant 0 : index
      %92 = vector.load %arg12[%c0_44, %c0_45, %c0_46, %c0_47] : memref<1x1x4x256xf32, #tpu.memory_space<vmem>>, vector<1x1x4x256xf32>
      %93 = vector.shape_cast %92 : vector<1x1x4x256xf32> to vector<4x256xf32>
      %94 = vector.shape_cast %91 : vector<4x256xf32> to vector<1x1x4x256xf32>
      tpu.vector_store %arg12[%c0_44, %c0_45, %c0_46, %c0_47], %94 {strides = array<i32>} : memref<1x1x4x256xf32, #tpu.memory_space<vmem>>, vector<1x1x4x256xf32>,
    } else {
    }
    return
  }
  func.func @transform_0(%arg0: i32, %arg1: i32, %arg2: i32) -> (i32, i32, i32, i32) {
    %c0_i32 = arith.constant 0 : i32
    %c0_i32_0 = arith.constant 0 : i32
    %c0_i32_1 = arith.constant 0 : i32
    %c0_i32_2 = arith.constant 0 : i32
    return %arg1, %c0_i32, %c0_i32_0, %c0_i32_1 : i32, i32, i32, i32
  }
  func.func @transform_1(%arg0: i32, %arg1: i32, %arg2: i32) -> (i32, i32) {
    %c0_i32 = arith.constant 0 : i32
    %c0_i32_0 = arith.constant 0 : i32
    %c0_i32_1 = arith.constant 0 : i32
    return %c0_i32, %c0_i32_0 : i32, i32
  }
  func.func @transform_2(%arg0: i32, %arg1: i32, %arg2: i32) -> (i32, i32) {
    %c0_i32 = arith.constant 0 : i32
    %c0_i32_0 = arith.constant 0 : i32
    %c0_i32_1 = arith.constant 0 : i32
    return %c0_i32, %c0_i32_0 : i32, i32
  }
  func.func @transform_3(%arg0: i32, %arg1: i32, %arg2: i32) -> (i32, i32, i32, i32) {
    %c0_i32 = arith.constant 0 : i32
    %c0_i32_0 = arith.constant 0 : i32
    %c0_i32_1 = arith.constant 0 : i32
    return %arg1, %arg2, %c0_i32, %c0_i32_0 : i32, i32, i32, i32
  }
  func.func @transform_4(%arg0: i32, %arg1: i32, %arg2: i32) -> (i32, i32) {
    %c0_i32 = arith.constant 0 : i32
    %c0_i32_0 = arith.constant 0 : i32
    %c0_i32_1 = arith.constant 0 : i32
    return %c0_i32, %c0_i32_0 : i32, i32
  }
  func.func @transform_5(%arg0: i32, %arg1: i32, %arg2: i32) -> (i32, i32) {
    %c0_i32 = arith.constant 0 : i32
    %c0_i32_0 = arith.constant 0 : i32
    %c0_i32_1 = arith.constant 0 : i32
    return %c0_i32, %c0_i32_0 : i32, i32
  }
  func.func @transform_6(%arg0: i32, %arg1: i32, %arg2: i32) -> (i32, i32) {
    %c0_i32 = arith.constant 0 : i32
    %c0_i32_0 = arith.constant 0 : i32
    %c0_i32_1 = arith.constant 0 : i32
    return %c0_i32, %c0_i32_0 : i32, i32
  }
  func.func @transform_7(%arg0: i32, %arg1: i32, %arg2: i32) -> (i32, i32) {
    %c0_i32 = arith.constant 0 : i32
    %c0_i32_0 = arith.constant 0 : i32
    %c0_i32_1 = arith.constant 0 : i32
    return %c0_i32, %c0_i32_0 : i32, i32
  }
  func.func @transform_8(%arg0: i32, %arg1: i32, %arg2: i32) -> (i32, i32, i32, i32) {
    %c0_i32 = arith.constant 0 : i32
    %c0_i32_0 = arith.constant 0 : i32
    %c0_i32_1 = arith.constant 0 : i32
    return %arg1, %arg2, %c0_i32, %c0_i32_0 : i32, i32, i32, i32
  }
  func.func @transform_9(%arg0: i32, %arg1: i32, %arg2: i32) -> (i32, i32, i32, i32) {
    %c0_i32 = arith.constant 0 : i32
    %c0_i32_0 = arith.constant 0 : i32
    %c0_i32_1 = arith.constant 0 : i32
    return %arg1, %arg2, %c0_i32, %c0_i32_0 : i32, i32, i32, i32
  }
}

</mosaic_0001>

<bundles_post_ra>
// kernel: tpu_custom_call.1
= control target key start
LH: loop header
LB: loop body
LE: loop exit
PB: predicated region body
PF: predicated region fallthrough
CT: control target
= control target key end

     0   :  { %s2385_s0 = inlined_call_operand.vmem [shape: f32[2,18,18,4], index: 0, kind: input, shape index: {}]   ;;  %s2386_s1 = inlined_call_operand.vmem [shape: f32[36,16], index: 1, kind: input, shape index: {}]   ;;  %s2387_s2 = inlined_call_operand.vmem [shape: f32[1,16], index: 2, kind: input, shape index: {}]   ;;  %s2388_s3 = inlined_call_operand.vmem [shape: f32[2,4,4,256], index: 3, kind: input, shape index: {}]   ;;  %s2389_s4 = inlined_call_operand.vmem [shape: f32[1,4], index: 4, kind: input, shape index: {}]   ;;  %s2390_s5 = inlined_call_operand.vmem [shape: f32[1,4], index: 5, kind: input, shape index: {}]   ;;  %s2391_s6 = inlined_call_operand.vmem [shape: f32[4,1], index: 6, kind: input, shape index: {}]   ;;  %s2392_s7 = inlined_call_operand.vmem [shape: f32[4,1], index: 7, kind: input, shape index: {}]   ;;  %s2393_s8 = inlined_call_operand.vmem [shape: f32[2,4,64,16], index: 8, kind: output, shape index: {0}]   ;;  %s2394_s9 = inlined_call_operand.hbm [shape: f32[2,4,4,256], index: 9, kind: output, shape index: {1}]  }
   0x1   :  { %2408 = sst [smem:[#allocation21_spill]] %s2392_s7 }
   0x2   :  { %2409 = sst [smem:[#allocation22_spill]] %s2394_s9 }
   0x3   :  { %15 = vsyncpa [#allocation7], 0 }
   0x4   :  { %17 = vsyncpa [#allocation7 + $0x1], 0  ;;  %s1722_s30 = smov 0   ;;  %s1724_s10 = smov 0  }
   0x5   :  { %s1726_s11 = smov 0   ;;  %s1728_s12 = smov 0  }
   0x6   :  { %s1730_s13 = smov 0   ;;  %s1732_s14 = smov 0  }
   0x7   :  { %s1734_s15 = smov 0   ;;  %s1736_s16 = smov 0  }
   0x8   :  { %s1738_s17 = smov 0   ;;  %s1740_s18 = smov 0  }
   0x9 LB: > { %2410 = sst [smem:[#allocation9_spill]] %s1616_s30  ;;  %s1350_s19 = sadd.s32 4294967295, %s1652_s18   ;;  %s1652_s18 = sphi %s1740_s18, %s23_s18   ;;  %s1648_s17 = sphi %s1738_s17, %s2439_s17   ;;  %s1644_s16 = sphi %s1736_s16, %s2438_s16   ;;  %s1640_s15 = sphi %s1734_s15, %s2437_s15   ;;  %s1636_s14 = sphi %s1732_s14, %s2436_s14   ;;  %s1632_s13 = sphi %s1730_s13, %s2435_s13   ;;  %s1628_s12 = sphi %s1728_s12, %s2434_s12   ;;  %s1624_s11 = sphi %s1726_s11, %s2433_s11   ;;  %s1620_s10 = sphi %s1724_s10, %s2441_s10   ;;  %s1616_s30 = sphi %s1722_s30, %s2440_s30  }
   0xa   : > { %2411 = sst [smem:[#allocation10_spill]] %s1624_s11  ;;  %s1351_s20 = sadd.s32 4294967294, %s1652_s18  }
   0xb   : > { %2412 = sst [smem:[#allocation11_spill]] %s1640_s15  ;;  %s35_s21 = sadd.s32 1, %s1640_s15 }
   0xc   : > { %2413 = sst [smem:[#allocation12_spill]] %s1644_s16  ;;  %s38_s22 = sadd.s32 1, %s1644_s16 }
   0xd   : > { %2414 = sst [smem:[#allocation13_spill]] %s1648_s17  ;;  %p36_p0 = scmp.ge.s32.totalorder %s35_s21, 4 }
   0xe   : > { %2415 = sst [smem:[#allocation14_spill]] %s1652_s18  ;;  %s42_s23 = sadd.s32 1, %s1648_s17 }
   0xf   : > { %s259_s24 = sadd.s32 1, %s1624_s11  ;;  %p269_p1 = scmp.ne.s32.totalorder %s1624_s11, %s1620_s10 }
  0x10   : > { %s2443_s21 = smov (%p36_p0, %s35_s21), 0  ;;  %s2445_s22 = smov (!%p36_p0, %s38_s22), %s1644_s16 }
  0x11   : > { %2416 = sst [smem:[#allocation15_spill]] %s2443_s21  ;;  %s255_s25 = ssub.s32 %s1640_s15, %s2443_s21 }
  0x12   : > { %p270_p2 = scmp.eq.s32.totalorder %s1350_s19, 15  ;;  %p40_p3 = scmp.ge.s32.totalorder %s2445_s22, 2 }
  0x13   : > { %p275_p4 = scmp.ne.s32.totalorder %s1620_s10, %s1616_s30  ;;  %p276_p6 = scmp.eq.s32.totalorder %s1351_s20, 15 }
  0x14   : > { %p1787_p5 = por %p270_p2, %p269_p1  ;;  %s2447_s22 = smov (%p40_p3, %s2445_s22), 0 }
  0x15   : > { %2419 = sst [smem:[#allocation17_spill]] %s2447_s22  ;;  %s2449_s23 = smov (!%p40_p3, %s42_s23), %s1648_s17 }
  0x16   : > { %s2417_s26 = scalar_select %p1787_p5, 1, 0 }
  0x17   : > { %s254_s27 = ssub.s32 %s1644_s16, %s2447_s22  ;;  %p1796_p7 = por %p276_p6, %p275_p4 }
  0x18   : > { %2418 = sst [smem:[#allocation16_spill]] %s2417_s26  ;;  %p44_p8 = scmp.ge.s32.totalorder %s2449_s23, 2 }
  0x19   : > { %s2420_s28 = scalar_select %p1796_p7, 1, 0 }
  0x1a   : > { %s256_s29 = sor.u32 %s255_s25, %s254_s27  ;;  %p1354_p10 = scmp.ge.s32.totalorder %s1652_s18, 1 }
  0x1b   : > { %2421 = sst [smem:[#allocation18_spill]] %s2420_s28  ;;  %p257_p9 = scmp.eq.s32.totalorder %s256_s29, 0 }
  0x1c   : > { %s2451_s23 = smov (%p44_p8, %s2449_s23), 0  ;;  %p332_p11 = scmp.lt.s32.totalorder %s1652_s18, 17 }
  0x1d   : > { %2422 = sst [smem:[#allocation19_spill]] %s2451_s23 }
  0x1e   : > { %s1804_s19 = scalar_select %p257_p9, %s1624_s11, %s259_s24  }
  0x1f   : > { %p333_p12 = pnand %p1354_p10, %p332_p11 }
  0x20   : > { %2423 = sst [smem:[#allocation20_spill]] %s1804_s19  ;;  %p386_p13 = scmp.lt.s32.totalorder (!%p333_p12), %s1632_s13, 1  ;;  %vm442_vm0 = vcmask (!%p333_p12), 1046528   ;;  %vm463_vm1 = vcmask (!%p333_p12), 1045504   ;;  %vm811_vm2 = vcmask (!%p333_p12), 1043456   ;;  %vm702_vm3 = vcmask (!%p333_p12), 31744  }
  0x21   : > { %336 = sbr.rel (%p333_p12) target bundleno = 873 (0x369), region = 52  ;;  %p393_p0 = scmp.lt.s32.totalorder (!%p333_p12), %s1628_s12, 3  ;;  %vm711_vm4 = vcmask (!%p333_p12), 64512   ;;  %vm720_vm5 = vcmask (!%p333_p12), 97280   ;;  %vm729_vm6 = vcmask (!%p333_p12), 130048   ;;  %vm738_vm7 = vcmask (!%p333_p12), 162816  }
  0x22   : > { %s1364_s20 = smul.u32 (!%p333_p12), 96, %s1628_s12  ;;  %s1655_s30 = smov (!%p333_p12), 8   ;;  %vm747_vm8 = vcmask (!%p333_p12), 195584   ;;  %vm756_vm9 = vcmask (!%p333_p12), 228352   ;;  %vm765_vm10 = vcmask (!%p333_p12), 261120   ;;  %vm786_vm11 = vcmask (!%p333_p12), 293888  }
  0x23   : > { %p921_p1 = scmp.eq.s32.totalorder (!%p333_p12), %s1636_s14, 0  ;;  %p922_p2 = scmp.eq.s32.totalorder (!%p333_p12), %s1632_s13, 0 }
  0x24   : > { %p925_p6 = scmp.eq.s32.totalorder (!%p333_p12), %s1628_s12, 0 }
  0x25   : > { %p923_p3 = pnand (!%p333_p12), %p922_p2, %p921_p1 }
  0x27   : > { %p924_p4 = pneg (!%p333_p12), %p923_p3 }
  0x28   : > { %s387_s22 = scalar_select %p386_p13, %s1632_s13, 1 }
  0x29   : > { %s394_s21 = scalar_select %p393_p0, %s1628_s12, 3 }
  0x2a   : > { %s1432_s25 = smul.u32 432, %s387_s22  ;;  %s1358_s27 = sshll.u32 %s387_s22, 3 }
  0x2b   : > { %s1357_s29 = sshll.u32 %s394_s21, 1  ;;  %s1360_s17 = sshll.u32 %s394_s21, 3 }
  0x2c   : > { %s390_s16 = scalar_lea.vmem %s2385_s0, %s1432_s25  ;;  %s397_s15 = sadd.s32 %s1358_s27, %s1357_s29 }
  0x2d   : > { %s1359_s19 = sshll.u32 %s397_s15, 2  ;;  %s1361_s11 = sshll.u32 %s387_s22, 5 }
  0x2e   : > { %s399_s18 = scalar_lea.vmem %s2388_s3, %s1359_s19  ;;  %s406_s9 = sadd.s32 %s1361_s11, %s1360_s17 }
  0x2f   : > { %s1362_s26 = sshll.u32 %s406_s9, 3  ;;  %s1818_s7 = scalar_lea.vmem %s390_s16, %s1364_s20  ;;  %v1820_v0 = vld [vmem:[%s399_s18] sm:$0xff] }
  0x30   : > { %s1825_s15 = scalar_lea.vmem %s2393_s8, %s1362_s26  ;;  %v1828_v1 = vld [vmem:[%s1818_s7 + $0x8] sm:$0xff]  ;;  %v414_v2 = vld [vmem:[%s1818_s7 + $0x10] sm:$0x3]  ;;  %v1832_v3 = vld [vmem:[%s1818_s7] sm:$0xff]  ;;  %s1654_s9 = smov 4  }
  0x31   : > { %v444_v4 = vrot.slane %v1828_v1, 1  ;;  %v446_v5 = vrot.slane %v414_v2, 1  ;;  %v443_v6 = vrot.slane %v1832_v3, 1  ;;  %v1837_v7 = vld [vmem:[%s1818_s7 + $0x38] sm:$0xff]  ;;  %v420_v8 = vld [vmem:[%s1818_s7 + $0x40] sm:$0x3]  ;;  %p2202_p8 = pnand %p925_p6, %p924_p4 }
  0x32   : > { %v454_v9 = vrot.slane %v1837_v7, 1  ;;  %v456_v10 = vrot.slane %v420_v8, 1  ;;  %v1842_v11 = vld [vmem:[%s1818_s7 + $0x30] sm:$0xff]  ;;  %v475_v15 = vrot.slane %v1837_v7, 2  ;;  %v464_v16 = vrot.slane %v1832_v3, 2  ;;  %v1864_v23 = vld [vmem:[%s1818_s7 + $0x68] sm:$0xff] }
  0x33   : > { %v447_v12 = vsel %vm442_vm0, %v444_v4, %v446_v5  ;;  %v445_v13 = vsel %vm442_vm0, %v443_v6, %v444_v4  ;;  %v453_v14 = vrot.slane %v1842_v11, 1  ;;  %v474_v19 = vrot.slane %v1842_v11, 2  ;;  %v426_v24 = vld [vmem:[%s1818_s7 + $0x70] sm:$0x3]  ;;  %v1872_v27 = vld [vmem:[%s1818_s7 + $0x60] sm:$0xff]  ;;  %v1884_v34 = vld [vmem:[%s1818_s7 + $0x78] sm:$0xff] }
  0x34   : > { %512 = vrot.lane.b32.xlu1 %v447_v12, %s1654_s9  ;;  %510 = vrot.lane.b32.xlu0 %v445_v13, %s1654_s9  ;;  %v1852_v17 = vsel %vm442_vm0, %v454_v9, %v456_v10  ;;  %v465_v20 = vrot.slane %v1828_v1, 2  ;;  %v477_v21 = vrot.slane %v420_v8, 2  ;;  %v467_v22 = vrot.slane %v414_v2, 2  ;;  %v1876_v29 = vld [vmem:[%s1818_s7 + $0x80] sm:$0xff]  ;;  %v429_v35 = vld [vmem:[%s1818_s7 + $0x88] sm:$0x3] }
  0x35   : > { %v1855_v18 = vsel %vm442_vm0, %v453_v14, %v454_v9  ;;  %v1868_v25 = vsel %vm463_vm1, %v474_v19, %v475_v15  ;;  %v487_v28 = vrot.slane %v1872_v27, 1  ;;  %v488_v31 = vrot.slane %v1864_v23, 1  ;;  %v1921_v52 = vld [vmem:[%s1818_s7 + $0x48] sm:$0xff]  ;;  %v1924_v53 = vld [vmem:[%s1818_s7 + $0x18] sm:$0xff]  ;;  %v1930_v55 = vld [vmem:[%s1818_s7 + $0x50] sm:$0xff]  ;;  %s1656_s11 = smov 12  }
  0x36   : > { %v466_v26 = vsel %vm463_vm1, %v464_v16, %v465_v20  ;;  %v1879_v30 = vsel %vm463_vm1, %v475_v15, %v477_v21  ;;  %v490_v32 = vrot.slane %v426_v24, 1  ;;  %v492_v33 = vrot.slane %v1872_v27, 2  ;;  %v1933_v56 = vld [vmem:[%s1818_s7 + $0x20] sm:$0xff]  ;;  %v423_v63 = vld [vmem:[%s1818_s7 + $0x58] sm:$0x3]  ;;  %s1657_s16 = smov 16  }
  0x37   : > { %v468_v36 = vsel %vm463_vm1, %v465_v20, %v467_v22  ;;  %v493_v37 = vrot.slane %v1864_v23, 2  ;;  %v495_v38 = vrot.slane %v426_v24, 2  ;;  %v500_v39 = vrot.slane %v1884_v34, 1  ;;  %v417_v2 = vld [vmem:[%s1818_s7 + $0x28] sm:$0x3]  ;;  %s1658_s7 = smov 20  }
  0x38   : > { %520 = vrot.lane.b32.xlu1 %v1852_v17, %s1654_s9  ;;  %518 = vrot.lane.b32.xlu0 %v1855_v18, %s1654_s9  ;;  %v1894_v40 = vsel %vm442_vm0, %v487_v28, %v488_v31  ;;  %v1897_v41 = vsel %vm442_vm0, %v488_v31, %v490_v32  ;;  %v505_v42 = vrot.slane %v1884_v34, 2  ;;  %v501_v43 = vrot.slane %v1876_v29, 1  ;;  %s1659_s17 = smov 24   ;;  %s1660_s18 = smov 28   ;;  %v774_v22 = vld [vmem:[%s2386_s1] sm:$0xff]  ;;  %v775_v24 = vld [vmem:[%s2386_s1 + $0x8] sm:$0xff] }
  0x39   : > { %v1902_v44 = vsel %vm463_vm1, %v492_v33, %v493_v37  ;;  %v1905_v45 = vsel %vm463_vm1, %v493_v37, %v495_v38  ;;  %v506_v46 = vrot.slane %v1876_v29, 2  ;;  %v503_v47 = vrot.slane %v429_v35, 1  ;;  %s383_s20 = sand.u32 1, %s1620_s10   ;;  %v778_v31 = vld [vmem:[%s2386_s1 + $0x20] sm:$0xf] }
  0x3a   : > { %v1909_v48 = vsel %vm442_vm0, %v500_v39, %v501_v43  ;;  %v508_v49 = vrot.slane %v429_v35, 2  ;;  %v458_v57 = vrot.slane %v1921_v52, 1  ;;  %v459_v58 = vrot.slane %v1930_v55, 1  ;;  %s2022_s25 = sshll.u32 %s383_s20, 3 }
  0x3b   : > { %v1915_v50 = vsel %vm442_vm0, %v501_v43, %v503_v47  ;;  %v1918_v51 = vsel %vm463_vm1, %v505_v42, %v506_v46  ;;  %v448_v59 = vrot.slane %v1924_v53, 1  ;;  %v449_v60 = vrot.slane %v1933_v56, 1 }
  0x3c   : > { %542 = vrot.lane.b32.xlu1 %v1868_v25, %s1655_s30  ;;  %534 = vrot.lane.b32.xlu0 %v466_v26, %s1655_s30  ;;  %v1927_v54 = vsel %vm463_vm1, %v506_v46, %v508_v49  ;;  %v1948_v61 = vsel %vm442_vm0, %v458_v57, %v459_v58  ;;  %v461_v4 = vrot.slane %v423_v63, 1  ;;  %v451_v5 = vrot.slane %v417_v2, 1 }
  0x3d   : > { %v450_v62 = vsel %vm442_vm0, %v448_v59, %v449_v60  ;;  %v479_v6 = vrot.slane %v1921_v52, 2  ;;  %v480_v8 = vrot.slane %v1930_v55, 2  ;;  %v469_v12 = vrot.slane %v1924_v53, 2 }
  0x3e   : > { %v1962_v9 = vsel %vm442_vm0, %v459_v58, %v461_v4  ;;  %v452_v10 = vsel %vm442_vm0, %v449_v60, %v451_v5  ;;  %v470_v13 = vrot.slane %v1933_v56, 2  ;;  %v482_v16 = vrot.slane %v423_v63, 2 }
  0x3f   : > { %v1971_v14 = vsel %vm463_vm1, %v479_v6, %v480_v8  ;;  %v472_v19 = vrot.slane %v417_v2, 2  ;;  %v1418_v26 = vpack.c.bf16 %v775_v24, %v774_v22  ;;  %vm930_vm12 = vcmask (!%p2202_p8), 24576  }
  0x40   : > { %544 = vrot.lane.b32.xlu1 %v1879_v30, %s1655_s30  ;;  %536 = vrot.lane.b32.xlu0 %v468_v36, %s1655_s30  ;;  %v471_v15 = vsel %vm463_vm1, %v469_v12, %v470_v13  ;;  %v1984_v20 = vsel %vm463_vm1, %v480_v8, %v482_v16  ;;  %vm933_vm13 = vcmask (!%p2202_p8), 3072  }
  0x41   : > { %v473_v21 = vsel %vm463_vm1, %v470_v13, %v472_v19  ;;  %1419 = vmatprep.subr.bf16.mxu0 %v1418_v26  ;;  %1426 = vmatprep.subr.bf16.mxu1 %v1418_v26 }
  0x42   : > { %1421 = vmatpush3.bf16.msra.mxu0 %v1418_v26  ;;  %1429 = vmatpush3.bf16.msra.mxu1 %v1418_v26 }
  0x44   : > { %566 = vrot.lane.b32.xlu1 %v1921_v52, %s1656_s11  ;;  %558 = vrot.lane.b32.xlu0 %v1924_v53, %s1656_s11 }
  0x48   : > { %568 = vrot.lane.b32.xlu1 %v1930_v55, %s1656_s11  ;;  %560 = vrot.lane.b32.xlu0 %v1933_v56, %s1656_s11 }
  0x4c   : > { %590 = vrot.lane.b32.xlu1 %v1948_v61, %s1657_s16  ;;  %582 = vrot.lane.b32.xlu0 %v450_v62, %s1657_s16 }
  0x50   : > { %522 = vrot.lane.b32.xlu1 %v1948_v61, %s1654_s9  ;;  %514 = vrot.lane.b32.xlu0 %v450_v62, %s1654_s9 }
  0x54   : > { %592 = vrot.lane.b32.xlu1 %v1962_v9, %s1657_s16  ;;  %584 = vrot.lane.b32.xlu0 %v452_v10, %s1657_s16 }
  0x58   : > { %614 = vrot.lane.b32.xlu1 %v1971_v14, %s1658_s7  ;;  %606 = vrot.lane.b32.xlu0 %v471_v15, %s1658_s7 }
  0x5c   : > { %524 = vrot.lane.b32.xlu1 %v1962_v9, %s1654_s9  ;;  %516 = vrot.lane.b32.xlu0 %v452_v10, %s1654_s9 }
  0x60   : > { %546 = vrot.lane.b32.xlu1 %v1971_v14, %s1655_s30  ;;  %538 = vrot.lane.b32.xlu0 %v471_v15, %s1655_s30 }
  0x64   : > { %616 = vrot.lane.b32.xlu1 %v1984_v20, %s1658_s7  ;;  %608 = vrot.lane.b32.xlu0 %v473_v21, %s1658_s7 }
  0x68   : > { %638 = vrot.lane.b32.xlu1 %v1872_v27, %s1659_s17  ;;  %630 = vrot.lane.b32.xlu0 %v1842_v11, %s1659_s17 }
  0x6c   : > { %548 = vrot.lane.b32.xlu1 %v1984_v20, %s1655_s30  ;;  %540 = vrot.lane.b32.xlu0 %v473_v21, %s1655_s30  ;;  %s1661_s30 = smov 32  }
  0x70   : > { %570 = vrot.lane.b32.xlu1 %v1872_v27, %s1656_s11  ;;  %562 = vrot.lane.b32.xlu0 %v1842_v11, %s1656_s11  ;;  %v776_v27 = vld [vmem:[%s2386_s1 + $0x10] sm:$0xff] }
  0x74   : > { %640 = vrot.lane.b32.xlu1 %v1864_v23, %s1659_s17  ;;  %632 = vrot.lane.b32.xlu0 %v1837_v7, %s1659_s17 }
  0x78   : > { %662 = vrot.lane.b32.xlu1 %v1894_v40, %s1660_s18  ;;  %654 = vrot.lane.b32.xlu0 %v1855_v18, %s1660_s18 }
  0x7c   : > { %572 = vrot.lane.b32.xlu1 %v1864_v23, %s1656_s11  ;;  %564 = vrot.lane.b32.xlu0 %v1837_v7, %s1656_s11  ;;  %v777_v23 = vld [vmem:[%s2386_s1 + $0x18] sm:$0xff] }
  0x7d   : > { %v1422_v28 = vpack.c.bf16 %v777_v23, %v776_v27 }
  0x7f   : > { %1423 = vmatprep.subr.bf16.mxu0 %v1422_v28  ;;  %1427 = vmatprep.subr.bf16.mxu1 %v1422_v28 }
  0x80   : > { %594 = vrot.lane.b32.xlu1 %v1894_v40, %s1657_s16  ;;  %586 = vrot.lane.b32.xlu0 %v1855_v18, %s1657_s16 }
  0x81   : > { %1425 = vmatpush3.bf16.msra.mxu0 %v1422_v28  ;;  %1430 = vmatpush3.bf16.msra.mxu1 %v1422_v28 }
  0x82   : > { %1404 = vmatprep.subr.msk.mxu0 %vm811_vm2, %v778_v31  ;;  %1428 = vmatprep.subr.msk.mxu1 %vm811_vm2, %v778_v31 }
  0x84   : > { %664 = vrot.lane.b32.xlu1 %v1897_v41, %s1660_s18  ;;  %656 = vrot.lane.b32.xlu0 %v1852_v17, %s1660_s18 }
  0x85   : > { %1405 = vmatpush3.msk.msra.mxu0 %vm811_vm2, %v778_v31  ;;  %1431 = vmatpush3.msk.msra.mxu1 %vm811_vm2, %v778_v31 }
  0x88   : > { %686 = vrot.lane.b32.xlu1 %v1902_v44, %s1661_s30  ;;  %678 = vrot.lane.b32.xlu0 %v1868_v25, %s1661_s30 }
  0x8c   : > { %596 = vrot.lane.b32.xlu1 %v1897_v41, %s1657_s16  ;;  %588 = vrot.lane.b32.xlu0 %v1852_v17, %s1657_s16 }
  0x90   : > { %618 = vrot.lane.b32.xlu1 %v1902_v44, %s1658_s7  ;;  %610 = vrot.lane.b32.xlu0 %v1868_v25, %s1658_s7 }
  0x94   : > { %688 = vrot.lane.b32.xlu1 %v1905_v45, %s1661_s30  ;;  %680 = vrot.lane.b32.xlu0 %v1879_v30, %s1661_s30 }
  0x98   : > { %620 = vrot.lane.b32.xlu1 %v1905_v45, %s1658_s7  ;;  %612 = vrot.lane.b32.xlu0 %v1879_v30, %s1658_s7 }
  0x9c   : > { %642 = vrot.lane.b32.xlu1 %v1884_v34, %s1659_s17  ;;  %634 = vrot.lane.b32.xlu0 %v1921_v52, %s1659_s17 }
  0xa0   : > { %644 = vrot.lane.b32.xlu1 %v1876_v29, %s1659_s17  ;;  %636 = vrot.lane.b32.xlu0 %v1930_v55, %s1659_s17  ;;  %s385_s17 = scalar_lea.vmem [#allocation6], %s2022_s25 }
  0xa4   : > { %666 = vrot.lane.b32.xlu1 %v1909_v48, %s1660_s18  ;;  %658 = vrot.lane.b32.xlu0 %v1948_v61, %s1660_s18 }
  0xa6   : > { %v513_v17 = vpop.permute.xlu1 %512  ;;  %v511_v18 = vpop.permute.xlu0 %510 }
  0xa7   : > { %v703_v29 = vsel %vm702_vm3, %v1832_v3, %v511_v18  ;;  %v704_v37 = vsel %vm702_vm3, %v1828_v1, %v513_v17 }
  0xa8   : > { %668 = vrot.lane.b32.xlu1 %v1915_v50, %s1660_s18  ;;  %660 = vrot.lane.b32.xlu0 %v1962_v9, %s1660_s18 }
  0xaa   : > { %v521_v25 = vpop.permute.xlu1 %520  ;;  %v519_v30 = vpop.permute.xlu0 %518 }
  0xab   : > { %v707_v32 = vsel %vm702_vm3, %v1842_v11, %v519_v30  ;;  %v708_v3 = vsel %vm702_vm3, %v1837_v7, %v521_v25 }
  0xac   : > { %690 = vrot.lane.b32.xlu1 %v1918_v51, %s1661_s30  ;;  %682 = vrot.lane.b32.xlu0 %v1971_v14, %s1661_s30 }
  0xae   : > { %v543_v33 = vpop.permute.xlu1 %542  ;;  %v535_v34 = vpop.permute.xlu0 %534 }
  0xaf   : > { %v716_v35 = vsel %vm711_vm4, %v707_v32, %v543_v33  ;;  %v712_v36 = vsel %vm711_vm4, %v703_v29, %v535_v34 }
  0xb0   : > { %692 = vrot.lane.b32.xlu1 %v1927_v54, %s1661_s30  ;;  %684 = vrot.lane.b32.xlu0 %v1984_v20, %s1661_s30 }
  0xb2   : > { %v545_v38 = vpop.permute.xlu1 %544  ;;  %v537_v11 = vpop.permute.xlu0 %536 }
  0xb3   : > { %v717_v39 = vsel %vm711_vm4, %v708_v3, %v545_v38  ;;  %v713_v40 = vsel %vm711_vm4, %v704_v37, %v537_v11 }
  0xb6   : > { %v567_v41 = vpop.permute.xlu1 %566  ;;  %v559_v42 = vpop.permute.xlu0 %558 }
  0xb7   : > { %v725_v22 = vsel %vm720_vm5, %v716_v35, %v567_v41  ;;  %v721_v24 = vsel %vm720_vm5, %v712_v36, %v559_v42 }
  0xba   : > { %v569_v43 = vpop.permute.xlu1 %568  ;;  %v561_v44 = vpop.permute.xlu0 %560 }
  0xbb   : > { %v2102_v45 = vsel %vm720_vm5, %v717_v39, %v569_v43  ;;  %v2105_v46 = vsel %vm720_vm5, %v713_v40, %v561_v44 }
  0xbe   : > { %v591_v1 = vpop.permute.xlu1 %590  ;;  %v583_v47 = vpop.permute.xlu0 %582 }
  0xbf   : > { %v734_v23 = vsel %vm729_vm6, %v725_v22, %v591_v1  ;;  %v730_v28 = vsel %vm729_vm6, %v721_v24, %v583_v47 }
  0xc2   : > { %v523_v7 = vpop.permute.xlu1 %522  ;;  %v515_v48 = vpop.permute.xlu0 %514 }
  0xc3   : > { %v709_v59 = vsel %vm702_vm3, %v1921_v52, %v523_v7  ;;  %v705_v60 = vsel %vm702_vm3, %v1924_v53, %v515_v48 }
  0xc6   : > { %v593_v49 = vpop.permute.xlu1 %592  ;;  %v585_v50 = vpop.permute.xlu0 %584 }
  0xc7   : > { %v735_v11 = vsel %vm729_vm6, %v2102_v45, %v593_v49  ;;  %v731_v39 = vsel %vm729_vm6, %v2105_v46, %v585_v50 }
  0xca   : > { %v615_v51 = vpop.permute.xlu1 %614  ;;  %v607_v54 = vpop.permute.xlu0 %606 }
  0xcb   : > { %v743_v31 = vsel %vm738_vm7, %v734_v23, %v615_v51  ;;  %v739_v17 = vsel %vm738_vm7, %v730_v28, %v607_v54 }
  0xce   : > { %v2107_v57 = vpop.permute.xlu1 %524  ;;  %v2109_v58 = vpop.permute.xlu0 %516 }
  0xd2   : > { %v547_v61 = vpop.permute.xlu1 %546  ;;  %v539_v62 = vpop.permute.xlu0 %538 }
  0xd3   : > { %v2116_v63 = vsel %vm711_vm4, %v709_v59, %v547_v61  ;;  %v2119_v2 = vsel %vm711_vm4, %v705_v60, %v539_v62 }
  0xd6   : > { %v617_v4 = vpop.permute.xlu1 %616  ;;  %v609_v5 = vpop.permute.xlu0 %608 }
  0xd7   : > { %v744_v40 = vsel %vm738_vm7, %v735_v11, %v617_v4  ;;  %v740_v41 = vsel %vm738_vm7, %v731_v39, %v609_v5 }
  0xda   : > { %v639_v6 = vpop.permute.xlu1 %638  ;;  %v631_v8 = vpop.permute.xlu0 %630 }
  0xdb   : > { %v752_v18 = vsel %vm747_vm8, %v743_v31, %v639_v6  ;;  %v748_v25 = vsel %vm747_vm8, %v739_v17, %v631_v8 }
  0xde   : > { %v2121_v9 = vpop.permute.xlu1 %548  ;;  %v2123_v10 = vpop.permute.xlu0 %540 }
  0xe2   : > { %v571_v52 = vpop.permute.xlu1 %570  ;;  %v563_v12 = vpop.permute.xlu0 %562 }
  0xe3   : > { %v727_v62 = vsel %vm720_vm5, %v2116_v63, %v571_v52  ;;  %v723_v4 = vsel %vm720_vm5, %v2119_v2, %v563_v12 }
  0xe6   : > { %v641_v13 = vpop.permute.xlu1 %640  ;;  %v633_v53 = vpop.permute.xlu0 %632 }
  0xe7   : > { %v753_v42 = vsel %vm747_vm8, %v744_v40, %v641_v13  ;;  %v749_v43 = vsel %vm747_vm8, %v740_v41, %v633_v53  ;;  %v710_v53 = vsel %vm702_vm3, %v1930_v55, %v2107_v57 }
  0xe8   : > { %v719_v2 = vsel %vm711_vm4, %v710_v53, %v2121_v9 }
  0xea   : > { %v663_v14 = vpop.permute.xlu1 %662  ;;  %v655_v15 = vpop.permute.xlu0 %654 }
  0xeb   : > { %v761_v30 = vsel %vm756_vm9, %v752_v18, %v663_v14  ;;  %v757_v29 = vsel %vm756_vm9, %v748_v25, %v655_v15  ;;  %v706_v14 = vsel %vm702_vm3, %v1933_v56, %v2109_v58 }
  0xec   : > { %v715_v52 = vsel %vm711_vm4, %v706_v14, %v2123_v10 }
  0xee   : > { %v2125_v16 = vpop.permute.xlu1 %572  ;;  %v2127_v19 = vpop.permute.xlu0 %564 }
  0xef   : > { %v728_v55 = vsel %vm720_vm5, %v719_v2, %v2125_v16  ;;  %v724_v56 = vsel %vm720_vm5, %v715_v52, %v2127_v19 }
  0xf2   : > { %v595_v20 = vpop.permute.xlu1 %594  ;;  %v587_v21 = vpop.permute.xlu0 %586 }
  0xf3   : > { %v736_v8 = vsel %vm729_vm6, %v727_v62, %v595_v20  ;;  %v732_v13 = vsel %vm729_vm6, %v723_v4, %v587_v21 }
  0xf6   : > { %v665_v26 = vpop.permute.xlu1 %664  ;;  %v657_v27 = vpop.permute.xlu0 %656 }
  0xf7   : > { %v762_v44 = vsel %vm756_vm9, %v753_v42, %v665_v26  ;;  %v758_v1 = vsel %vm756_vm9, %v749_v43, %v657_v27 }
  0xfa   : > { %v687_v32 = vpop.permute.xlu1 %686  ;;  %v679_v33 = vpop.permute.xlu0 %678 }
  0xfb   : > { %v766_v34 = vsel %vm765_vm10, %v757_v29, %v679_v33  ;;  %v770_v35 = vsel %vm765_vm10, %v761_v30, %v687_v32  ;;  %v1365_v29 = vld [vmem:[%s2387_s2] ss:$0 sm:$0xff] }
  0xfc   : > { %1406 = vmatprep.mubr.msk.f32.mxu0 %vm786_vm11, %v766_v34  ;;  %1412 = vmatprep.mubr.msk.f32.mxu1 %vm786_vm11, %v770_v35 }
  0xfe   : > { %v597_v36 = vpop.permute.xlu1 %596  ;;  %v589_v37 = vpop.permute.xlu0 %588 }
  0xff   : > { %v737_v9 = vsel %vm729_vm6, %v728_v55, %v597_v36  ;;  %v733_v10 = vsel %vm729_vm6, %v724_v56, %v589_v37 }
 0x102   : > { %v619_v3 = vpop.permute.xlu1 %618  ;;  %v611_v38 = vpop.permute.xlu0 %610 }
 0x103   : > { %v745_v15 = vsel %vm738_vm7, %v736_v8, %v619_v3  ;;  %v741_v63 = vsel %vm738_vm7, %v732_v13, %v611_v38 }
 0x106   : > { %v689_v47 = vpop.permute.xlu1 %688  ;;  %v681_v7 = vpop.permute.xlu0 %680 }
 0x107   : > { %v771_v48 = vsel %vm765_vm10, %v762_v44, %v689_v47  ;;  %v767_v45 = vsel %vm765_vm10, %v758_v1, %v681_v7  ;;  %v1662_v47 = vmov (!%p2202_p8), 0.0  }
 0x108   : > { %1407 = vmatmul.mubr.msk.f32.vlgmr.msra.gmra.mrb[0].mxu0 %vm786_vm11, %v767_v45  ;;  %1413 = vmatmul.mubr.msk.f32.vlgmr.msra.gmra.mrb[0].mxu1 %vm786_vm11, %v771_v48  ;;  %931 = vst.msk [vmem:[#allocation2] sm:$0x1] (!%p2202_p8), %vm930_vm12, %v1662_v47  ;;  %932 = vst.msk [vmem:[#allocation3] sm:$0x1] (!%p2202_p8), %vm930_vm12, %v1662_v47 }
 0x109   : > { %934 = vst.msk [vmem:[#allocation4] sm:$0xf] (!%p2202_p8), %vm933_vm13, %v1662_v47  ;;  %935 = vst.msk [vmem:[#allocation5] sm:$0xf] (!%p2202_p8), %vm933_vm13, %v1662_v47 }
 0x10a   : > { %v621_v46 = vpop.permute.xlu1 %620  ;;  %v613_v49 = vpop.permute.xlu0 %612 }
 0x10b   : > { %v746_v16 = vsel %vm738_vm7, %v737_v9, %v621_v46  ;;  %v742_v19 = vsel %vm738_vm7, %v733_v10, %v613_v49 }
 0x10e   : > { %v643_v50 = vpop.permute.xlu1 %642  ;;  %v635_v51 = vpop.permute.xlu0 %634 }
 0x10f   : > { %v754_v12 = vsel %vm747_vm8, %v745_v15, %v643_v50  ;;  %v750_v20 = vsel %vm747_vm8, %v741_v63, %v635_v51 }
 0x112   : > { %v645_v54 = vpop.permute.xlu1 %644  ;;  %v637_v59 = vpop.permute.xlu0 %636 }
 0x113   : > { %v755_v27 = vsel %vm747_vm8, %v746_v16, %v645_v54  ;;  %v751_v23 = vsel %vm747_vm8, %v742_v19, %v637_v59 }
 0x116   : > { %v667_v60 = vpop.permute.xlu1 %666  ;;  %v659_v61 = vpop.permute.xlu0 %658 }
 0x117   : > { %v763_v57 = vsel %vm756_vm9, %v754_v12, %v667_v60  ;;  %v759_v58 = vsel %vm756_vm9, %v750_v20, %v659_v61 }
 0x11a   : > { %v669_v5 = vpop.permute.xlu1 %668  ;;  %v661_v6 = vpop.permute.xlu0 %660 }
 0x11b   : > { %v764_v28 = vsel %vm756_vm9, %v755_v27, %v669_v5  ;;  %v760_v31 = vsel %vm756_vm9, %v751_v23, %v661_v6 }
 0x11e   : > { %v691_v21 = vpop.permute.xlu1 %690  ;;  %v683_v22 = vpop.permute.xlu0 %682 }
 0x11f   : > { %v772_v24 = vsel %vm765_vm10, %v763_v57, %v691_v21  ;;  %v768_v26 = vsel %vm765_vm10, %v759_v58, %v683_v22 }
 0x120   : > { %1409 = vmatprep.mubr.msk.f32.mxu0 %vm786_vm11, %v768_v26  ;;  %1415 = vmatprep.mubr.msk.f32.mxu1 %vm786_vm11, %v772_v24 }
 0x122   : > { %v693_v17 = vpop.permute.xlu1 %692  ;;  %v685_v18 = vpop.permute.xlu0 %684 }
 0x123   : > { %v773_v25 = vsel %vm765_vm10, %v764_v28, %v693_v17  ;;  %v769_v30 = vsel %vm765_vm10, %v760_v31, %v685_v18 }
 0x124   : > { %1410 = vmatmul.mubr.msk.f32.gmra.mrb[2].mxu0 %vm786_vm11, %v769_v30  ;;  %1416 = vmatmul.mubr.msk.f32.gmra.mrb[2].mxu1 %vm786_vm11, %v773_v25 }
 0x1db   : > { %v1408_v32 = vpop.f32.mrb[0].mxu0  ;;  %v1414_v33 = vpop.f32.mrb[0].mxu1 }
 0x1dc   : > { %v2209_v34 = vadd.f32 %v1408_v32, %v1365_v29  ;;  %v2211_v35 = vadd.f32 %v1414_v33, %v1365_v29  ;;  %v881_v36 = vpop.f32.mrb[1].mxu0  ;;  %v901_v37 = vpop.f32.mrb[1].mxu1 }
 0x1dd   : > { %v2213_v3 = vadd.f32 %v1365_v29, %v881_v36  ;;  %v2215_v38 = vadd.f32 %v1365_v29, %v901_v37 }
 0x1f3   : > { %929 = sbr.rel (%p2202_p8) target bundleno = 506 (0x1fa), region = 56 }
 0x1f7   : > { %v1411_v11 = vpop.f32.mrb[2].mxu0  ;;  %v1417_v39 = vpop.f32.mrb[2].mxu1 }
 0x1f8   : > { %v2217_v40 = vadd.f32 %v1411_v11, %v1365_v29  ;;  %v2219_v41 = vadd.f32 %v1417_v39, %v1365_v29  ;;  %v891_v42 = vpop.f32.mrb[3].mxu0  ;;  %v911_v43 = vpop.f32.mrb[3].mxu1 }
 0x1f9   : > { %v2221_v44 = vadd.f32 %v1365_v29, %v891_v42  ;;  %v2223_v1 = vadd.f32 %v1365_v29, %v911_v43 }
 0x1fa PF: > { %p1375_p9 = scmp.ne.s32.totalorder %s1636_s14, 0 }
 0x1fb   : > { %v1024_v7 = vcombine.high (!%p1375_p9), %v1820_v0, %v1820_v0  ;;  %v1026_v48 = vsel (!%p1375_p9), %vm811_vm2, %v1820_v0, 0.0  ;;  %v1035_v45 = vmul.f32 (!%p1375_p9), %v1820_v0, %v1820_v0  ;;  %v939_v46 = vsel (!%p1375_p9), %vm729_vm6, %v2213_v3, 0.0  ;;  %s1663_s18 = smov (!%p1375_p9), 124   ;;  %s1664_s22 = smov (!%p1375_p9), 120  }
 0x1fc   : > { %938 = sbr.rel (%p1375_p9) target bundleno = 671 (0x29f), region = 60  ;;  %v940_v49 = vsel (!%p1375_p9), %vm729_vm6, %v2209_v34, 0.0  ;;  %v942_v50 = vsel (!%p1375_p9), %vm729_vm6, %v2221_v44, 0.0  ;;  %v944_v62 = vsel (!%p1375_p9), %vm729_vm6, %v2217_v40, 0.0  ;;  %v960_v6 = vmul.f32 (!%p1375_p9), %v2213_v3, %v2213_v3  ;;  %s1665_s26 = smov (!%p1375_p9), 116  }
 0x1fd   : > { %v1027_v51 = vsel (!%p1375_p9), %vm811_vm2, %v1024_v7, 0.0  ;;  %v1037_v54 = vcombine.high (!%p1375_p9), %v1035_v45, %v1035_v45  ;;  %v1039_v59 = vsel (!%p1375_p9), %vm811_vm2, %v1035_v45, 0.0  ;;  %v941_v60 = vadd.f32 (!%p1375_p9), %v940_v49, %v939_v46 }
 0x1fe   : > { %v1028_v61 = vadd.f32 (!%p1375_p9), %v1027_v51, %v1026_v48  ;;  %v961_v8 = vmul.f32 (!%p1375_p9), %v2209_v34, %v2209_v34  ;;  %v946_v53 = vsel (!%p1375_p9), %vm729_vm6, %v2215_v38, 0.0  ;;  %v962_v14 = vmul.f32 (!%p1375_p9), %v2221_v44, %v2221_v44 }
 0x1ff   : > { %v1040_v4 = vsel (!%p1375_p9), %vm811_vm2, %v1037_v54, 0.0  ;;  %v943_v5 = vadd.f32 (!%p1375_p9), %v942_v50, %v941_v60  ;;  %v963_v15 = vmul.f32 (!%p1375_p9), %v2217_v40, %v2217_v40  ;;  %v948_v2 = vsel (!%p1375_p9), %vm729_vm6, %v2211_v35, 0.0  ;;  %v1022_v50 = vld [vmem:[#allocation4] sm:$0xf] (!%p1375_p9)  ;;  %v1034_v60 = vld [vmem:[#allocation5] sm:$0xf] (!%p1375_p9) }
 0x200   : > { %1029 = vadd.xlane.f32.xlu0 (!%p1375_p9), %v1028_v61  ;;  %v1041_v13 = vadd.f32 (!%p1375_p9), %v1040_v4, %v1039_v59  ;;  %v964_v52 = vmul.f32 (!%p1375_p9), %v2215_v38, %v2215_v38  ;;  %v968_v12 = vsel (!%p1375_p9), %vm729_vm6, %v960_v6, 0.0  ;;  %v969_v20 = vsel (!%p1375_p9), %vm729_vm6, %v961_v8, 0.0 }
 0x201   : > { %v945_v63 = vadd.f32 (!%p1375_p9), %v944_v62, %v943_v5  ;;  %v971_v55 = vsel (!%p1375_p9), %vm729_vm6, %v962_v14, 0.0  ;;  %v970_v57 = vadd.f32 (!%p1375_p9), %v969_v20, %v968_v12  ;;  %v950_v58 = vsel (!%p1375_p9), %vm729_vm6, %v2223_v1, 0.0  ;;  %v989_v14 = vld [vmem:[#allocation2] sm:$0x1] (!%p1375_p9) }
 0x202   : > { %v965_v21 = vmul.f32 (!%p1375_p9), %v2211_v35, %v2211_v35  ;;  %v973_v22 = vsel (!%p1375_p9), %vm729_vm6, %v963_v15, 0.0  ;;  %v952_v24 = vsel (!%p1375_p9), %vm729_vm6, %v2219_v41, 0.0  ;;  %v966_v26 = vmul.f32 (!%p1375_p9), %v2223_v1, %v2223_v1 }
 0x203   : > { %v947_v56 = vadd.f32 %v946_v53, %v945_v63  ;;  %v972_v10 = vadd.f32 %v971_v55, %v970_v57  ;;  %v975_v16 = vsel %vm729_vm6, %v964_v52, 0.0  ;;  %v967_v23 = vmul.f32 %v2219_v41, %v2219_v41 }
 0x204   : > { %1042 = vadd.xlane.f32.xlu0 %v1041_v13  ;;  %v977_v28 = vsel %vm729_vm6, %v965_v21, 0.0  ;;  %v979_v18 = vsel %vm729_vm6, %v966_v26, 0.0  ;;  %vm1032_vm14 = vcmask 3072   ;;  %vm1004_vm15 = vcmask 24576  }
 0x205   : > { %v949_v9 = vadd.f32 %v948_v2, %v947_v56  ;;  %v974_v27 = vadd.f32 %v973_v22, %v972_v10  ;;  %v981_v29 = vsel %vm729_vm6, %v967_v23, 0.0  ;;  %v1006_v2 = vld [vmem:[#allocation3] sm:$0x1] }
 0x207   : > { %v951_v19 = vadd.f32 %v950_v58, %v949_v9  ;;  %v976_v17 = vadd.f32 %v975_v16, %v974_v27 }
 0x209   : > { %v953_v31 = vadd.f32 %v952_v24, %v951_v19  ;;  %v978_v30 = vadd.f32 %v977_v28, %v976_v17 }
 0x20b   : > { %v954_v25 = vrot.slane %v953_v31, 4  ;;  %v980_v33 = vadd.f32 %v979_v18, %v978_v30 }
 0x20d   : > { %v955_v32 = vadd.f32 %v954_v25, %v953_v31  ;;  %v982_v37 = vadd.f32 %v981_v29, %v980_v33 }
 0x20f   : > { %v956_v36 = vrot.slane %v955_v32, 2  ;;  %v983_v39 = vrot.slane %v982_v37, 4 }
 0x211   : > { %v957_v11 = vadd.f32 %v956_v36, %v955_v32  ;;  %v984_v43 = vadd.f32 %v983_v39, %v982_v37 }
 0x213   : > { %v958_v42 = vrot.slane %v957_v11, 1  ;;  %v985_v7 = vrot.slane %v984_v43, 2 }
 0x215   : > { %v959_v47 = vadd.f32 %v958_v42, %v957_v11  ;;  %v986_v48 = vadd.f32 %v985_v7, %v984_v43 }
 0x217   : > { %991 = vrot.lane.b32.xlu1 %v959_v47, %s1663_s18  ;;  %v987_v45 = vrot.slane %v986_v48, 1 }
 0x219   : > { %v988_v46 = vadd.f32 %v987_v45, %v986_v48 }
 0x21a   : > { %995 = vrot.lane.b32.xlu0 %v959_v47, %s1664_s22 }
 0x21b   : > { %999 = vrot.lane.b32.xlu1 %v959_v47, %s1665_s26 }
 0x21f   : > { %1008 = vrot.lane.b32.xlu1 %v988_v46, %s1663_s18 }
 0x223   : > { %1012 = vrot.lane.b32.xlu1 %v988_v46, %s1664_s22 }
 0x227   : > { %1016 = vrot.lane.b32.xlu1 %v988_v46, %s1665_s26 }
 0x289   : > { %v992_v49 = vpop.permute.xlu1 %991 }
 0x28a   : > { %v994_v5 = vadd.f32 %v992_v49, %v959_v47 }
 0x28d   : > { %v1000_v51 = vpop.permute.xlu1 %999  ;;  %v1030_v54 = vpop.xlane.xlu0 %1029 }
 0x28e   : > { %v1031_v59 = vadd.f32 %v1030_v54, %v1022_v50 }
 0x290   : > { %1033 = vst.msk [vmem:[#allocation4] sm:$0xf] %vm1032_vm14, %v1031_v59 }
 0x291   : > { %v1009_v61 = vpop.permute.xlu1 %1008  ;;  %v1043_v62 = vpop.xlane.xlu0 %1042 }
 0x292   : > { %v1044_v4 = vadd.f32 %v1043_v62, %v1034_v60  ;;  %v1011_v13 = vadd.f32 %v1009_v61, %v988_v46 }
 0x294   : > { %1045 = vst.msk [vmem:[#allocation5] sm:$0xf] %vm1032_vm14, %v1044_v4 }
 0x295   : > { %v1013_v6 = vpop.permute.xlu1 %1012  ;;  %v996_v8 = vpop.permute.xlu0 %995 }
 0x296   : > { %v998_v53 = vadd.f32 %v996_v8, %v994_v5  ;;  %v1015_v15 = vadd.f32 %v1013_v6, %v1011_v13 }
 0x298   : > { %v1002_v63 = vadd.f32 %v1000_v51, %v998_v53 }
 0x299   : > { %v1017_v52 = vpop.permute.xlu1 %1016 }
 0x29a   : > { %v1003_v12 = vadd.f32 %v1002_v63, %v989_v14  ;;  %v1019_v20 = vadd.f32 %v1017_v52, %v1015_v15 }
 0x29c   : > { %1005 = vst.msk [vmem:[#allocation2] sm:$0x1] %vm1004_vm15, %v1003_v12  ;;  %v1020_v55 = vadd.f32 %v1019_v20, %v1006_v2 }
 0x29e   : > { %1021 = vst.msk [vmem:[#allocation3] sm:$0x1] %vm1004_vm15, %v1020_v55 }
 0x29f PF: > { %p1376_p10 = scmp.ne.s32.totalorder %s1636_s14, 1 }
 0x2a0   : > { %v1137_v56 = vld [vmem:[#allocation4] sm:$0xf] (!%p1376_p10)  ;;  %v1139_v57 = vld [vmem:[#allocation5] sm:$0xf] (!%p1376_p10)  ;;  %v1666_v58 = vmov (!%p1376_p10), 0   ;;  %v1064_v17 = vlaneseq (!%p1376_p10)  ;;  %s2425_s9 = sld [smem:[#allocation21_spill]] (!%p1376_p10) }
 0x2a1   : > { %1049 = sbr.rel (%p1376_p10) target bundleno = 847 (0x34f), region = 64  ;;  %1537 = vset.pattern.permute.xlu0 (!%p1376_p10), %v1666_v58  ;;  %v1138_v21 = vmul.f32 (!%p1376_p10), 0.00048828125, %v1137_v56  ;;  %v1140_v22 = vmul.f32 (!%p1376_p10), 0.00048828125, %v1139_v57  ;;  %v1143_v25 = vld [vmem:[%s2391_s6] sm:$0xf] (!%p1376_p10)  ;;  %s1667_s30 = smov (!%p1376_p10), 4  }
 0x2a2   : > { %v1065_v18 = vshrl.u32 (!%p1376_p10), %v1064_v17, 7  ;;  %v1056_v30 = vld [vmem:[%s2389_s4] sm:$0x1] (!%p1376_p10)  ;;  %s1668_s11 = smov (!%p1376_p10), 12   ;;  %s1669_s16 = smov (!%p1376_p10), 8  }
 0x2a3   : > { %v1050_v9 = vld [vmem:[#allocation2] sm:$0x1] (!%p1376_p10)  ;;  %v1141_v26 = vmul.f32 (!%p1376_p10), %v1138_v21, %v1138_v21  ;;  %v1670_v46 = vmov (!%p1376_p10), 839922192  }
 0x2a4   : > { %v1051_v10 = vmul.f32 (!%p1376_p10), 0.00048828125, %v1050_v9  ;;  %v1066_v32 = vsub.s32 (!%p1376_p10), 0, %v1065_v18  ;;  %v1060_v39 = vld [vmem:[%s2390_s5] sm:$0x1] (!%p1376_p10)  ;;  %v1155_v49 = vunpack.c.l.s4 (!%p1376_p10), %v1670_v46 }
 0x2a5   : > { %v1052_v24 = vld [vmem:[#allocation3] sm:$0x1] (!%p1376_p10)  ;;  %v1142_v27 = vsub.f32 (!%p1376_p10), %v1140_v22, %v1141_v26 }
 0x2a6   : > { %v1053_v16 = vmul.f32 (!%p1376_p10), 0.00048828125, %v1052_v24  ;;  %v1054_v19 = vmul.f32 (!%p1376_p10), %v1051_v10, %v1051_v10  ;;  %v1147_v43 = vld [vmem:[%s2425_s9] sm:$0xf] (!%p1376_p10)  ;;  %v1156_v51 = vunpack.c.0.s8 (!%p1376_p10), %v1155_v49 }
 0x2a7   : > { %v1144_v28 = vadd.f32 (!%p1376_p10), 1e-05, %v1142_v27 }
 0x2a8   : > { %v1055_v23 = vsub.f32 %v1053_v16, %v1054_v19  ;;  %v1159_v61 = vsub.s32 %v1156_v51, %v1065_v18 }
 0x2a9   : > { %1538 = vrsqrt.f32 %v1144_v28 }
 0x2aa   : > { %v1057_v31 = vadd.f32 1e-05, %v1055_v23 }
 0x2ac   : > { %1540 = vrsqrt.f32 %v1057_v31 }
 0x2b3   : > { %v1539_v29 = vpop.eup %1538 }
 0x2b4   : > { %v1146_v36 = vmul.f32 %v1539_v29, %v1143_v25 }
 0x2b6   : > { %v1541_v33 = vpop.eup %1540  ;;  %1152 = vperm.xlu0 %1537, %v1146_v36   ;;  %v1148_v11 = vmul.f32 %v1146_v36, %v1138_v21 }
 0x2b7   : > { %v1059_v37 = vmul.f32 %v1541_v33, %v1056_v30 }
 0x2b8   : > { %v1149_v48 = vsub.f32 %v1147_v43, %v1148_v11 }
 0x2b9   : > { %v1067_v42 = vrot.slane %v1059_v37, %v1066_v32  ;;  %v1061_v47 = vmul.f32 %v1059_v37, %v1051_v10 }
 0x2bb   : > { %1068 = vrot.lane.b32.xlu1 %v1067_v42, %s1667_s30  ;;  %v1062_v7 = vsub.f32 %v1060_v39, %v1061_v47  ;;  %1074 = vrot.lane.b32.xlu0 %v1067_v42, %s1668_s11 }
 0x2bd   : > { %v1084_v45 = vrot.slane %v1062_v7, %v1066_v32 }
 0x2bf   : > { %1071 = vrot.lane.b32.xlu1 %v1067_v42, %s1669_s16  ;;  %1165 = vperm.xlu0 %1537, %v1149_v48  }
 0x2c3   : > { %1085 = vrot.lane.b32.xlu1 %v1084_v45, %s1667_s30  ;;  %1088 = vrot.lane.b32.xlu0 %v1084_v45, %s1669_s16 }
 0x2c7   : > { %1091 = vrot.lane.b32.xlu1 %v1084_v45, %s1668_s11 }
 0x32d   : > { %v1069_v50 = vpop.permute.xlu1 %1068 }
 0x32e   : > { %v1077_v59 = vsel %vm702_vm3, %v1059_v37, %v1069_v50 }
 0x331   : > { %v1072_v60 = vpop.permute.xlu1 %1071 }
 0x332   : > { %v1078_v62 = vsel %vm711_vm4, %v1077_v59, %v1072_v60 }
 0x335   : > { %v1153_v54 = vpop.permute.xlu0 %1152  ;;  %v1086_v5 = vpop.permute.xlu1 %1085 }
 0x336   : > { %v1160_v6 = vrot.slane %v1153_v54, %v1159_v61  ;;  %v1094_v52 = vsel %vm702_vm3, %v1062_v7, %v1086_v5 }
 0x338   : > { %v1162_v53 = vmul.f32 %v1160_v6, %v1820_v0 }
 0x339   : > { %v1075_v4 = vpop.permute.xlu0 %1074  ;;  %v1092_v63 = vpop.permute.xlu1 %1091 }
 0x33a   : > { %v1079_v8 = vsel %vm720_vm5, %v1078_v62, %v1075_v4 }
 0x33b   : > { %v1100_v14 = vrot.slane %v1079_v8, %v1066_v32 }
 0x33d   : > { %v1101_v55 = vmul.f32 %v1100_v14, %v2213_v3  ;;  %v1102_v58 = vmul.f32 %v1100_v14, %v2209_v34  ;;  %v1103_v21 = vmul.f32 %v1100_v14, %v2221_v44  ;;  %v1104_v0 = vmul.f32 %v1100_v14, %v2217_v40 }
 0x33e   : > { %v1166_v13 = vpop.permute.xlu0 %1165  ;;  %v1105_v9 = vmul.f32 %v1100_v14, %v2215_v38  ;;  %v1106_v10 = vmul.f32 %v1100_v14, %v2211_v35  ;;  %v1107_v24 = vmul.f32 %v1100_v14, %v2223_v1  ;;  %v1108_v26 = vmul.f32 %v1100_v14, %v2219_v41 }
 0x33f   : > { %v1173_v15 = vrot.slane %v1166_v13, %v1159_v61 }
 0x341   : > { %v1175_v2 = vadd.f32 %v1173_v15, %v1162_v53 }
 0x342   : > { %v1089_v12 = vpop.permute.xlu0 %1088 }
 0x343   : > { %v1095_v20 = vsel %vm711_vm4, %v1094_v52, %v1089_v12  ;;  %v1176_v56 = vmax.f32 %v1175_v2, 0.0 }
 0x344   : > { %v1096_v57 = vsel %vm720_vm5, %v1095_v20, %v1092_v63 }
 0x345   : > { %v1112_v22 = vrot.slane %v1096_v57, %v1066_v32  ;;  %1177 = vst [vmem:[%s385_s17] sm:$0xff] %v1176_v56 }
 0x347   : > { %v1113_v3 = vadd.f32 %v1112_v22, %v1101_v55  ;;  %v1114_v16 = vadd.f32 %v1112_v22, %v1102_v58  ;;  %v1115_v34 = vadd.f32 %v1112_v22, %v1103_v21  ;;  %v1116_v44 = vadd.f32 %v1112_v22, %v1104_v0 }
 0x348   : > { %v1117_v40 = vadd.f32 %v1112_v22, %v1105_v9  ;;  %v1118_v19 = vadd.f32 %v1112_v22, %v1106_v10  ;;  %v1119_v38 = vadd.f32 %v1112_v22, %v1107_v24  ;;  %v1120_v35 = vadd.f32 %v1112_v22, %v1108_v26 }
 0x349   : > { %v1121_v1 = vmax.f32 %v1113_v3, 0.0  ;;  %v1122_v41 = vmax.f32 %v1114_v16, 0.0  ;;  %v1123_v27 = vmax.f32 %v1115_v34, 0.0  ;;  %v1124_v23 = vmax.f32 %v1116_v44, 0.0 }
 0x34a   : > { %v1125_v28 = vmax.f32 %v1117_v40, 0.0  ;;  %v1126_v31 = vmax.f32 %v1118_v19, 0.0  ;;  %v1127_v17 = vmax.f32 %v1119_v38, 0.0  ;;  %v1128_v18 = vmax.f32 %v1120_v35, 0.0 }
 0x34b   : > { %1129 = vst.msk [vmem:[%s1825_s15] sm:$0xff] %vm729_vm6, %v1121_v1  ;;  %1130 = vst.msk [vmem:[%s1825_s15 + $0x8] sm:$0xff] %vm729_vm6, %v1122_v41 }
 0x34c   : > { %1131 = vst.msk [vmem:[%s1825_s15 + $0x10] sm:$0xff] %vm729_vm6, %v1123_v27  ;;  %1132 = vst.msk [vmem:[%s1825_s15 + $0x18] sm:$0xff] %vm729_vm6, %v1124_v23 }
 0x34d   : > { %1133 = vst.msk [vmem:[%s1825_s15 + $0x20] sm:$0xff] %vm729_vm6, %v1125_v28  ;;  %1134 = vst.msk [vmem:[%s1825_s15 + $0x28] sm:$0xff] %vm729_vm6, %v1126_v31 }
 0x34e   : > { %1135 = vst.msk [vmem:[%s1825_s15 + $0x30] sm:$0xff] %vm729_vm6, %v1127_v17  ;;  %1136 = vst.msk [vmem:[%s1825_s15 + $0x38] sm:$0xff] %vm729_vm6, %v1128_v18 }
 0x34f PF: > { %s1378_s18 = sshll.u32 %s1628_s12, 1  ;;  %s1379_s22 = sshll.u32 %s1632_s13, 3 }
 0x350   : > { %s1207_s26 = sshll.u32 %s385_s17, 4  ;;  %s1203_s14 = sadd.s32 %s1379_s22, %s1378_s18  ;;  %s2328_s26 = int_to_ptr.vmem [resolvable:$true] %s1207_s26 }
 0x351   : > { %s1380_s28 = sshll.u32 %s1203_s14, 6  ;;  %s2427_s15 = sld [smem:[#allocation22_spill]] }
 0x352   : > { %s1188_s21 = scalar_lea.sflag [#allocation7], %s383_s20  ;;  %s1542_s23 = scalar_lea.vmem %s2328_s26, 128 }
 0x353   : > { %p1543_p11 = scmp.ne.s32.totalorder %s2328_s26, %s1542_s23  ;;  %s1671_s12 = smov [#allocation6]  }
 0x354   : > { %s1546_s13 = sshll.u32 %s1671_s12, 4  ;;  %s1547_s13 = int_to_ptr.vmem [resolvable:$false] %s1546_s13 }
 0x355   : > { %p1544_p12 = pnand %p1543_p11, %p1787_p5  ;;  %s1548_s25 = scalar_lea.vmem %s1547_s13, 256 }
 0x356   : > { %p1549_p0 = scmp.lt.s32.totalorder %s2328_s26, %s1547_s13  ;;  %p1550_p1 = scmp.lt.s32.totalorder %s1548_s25, %s1542_s23 }
 0x357   : > { %s2428_s29 = smov %s2427_s15  ;;  %s1205_s24 = scalar_lea.hbm %s2427_s15, %s1380_s28 }
 0x358   : > { %p1545_p13 = pneg %p1544_p12  ;;  %p1551_p2 = por %p1550_p1, %p1549_p0 }
 0x35a   : > { %p1552_p3 = pnand %p1551_p2, %p1545_p13 }
 0x35c   : > { %1555 = shalt.err (!%p1552_p3)
}
 0x35d   : > { %s1556_s17 = scalar_lea.hbm %s1205_s24, 128  ;;  %s1560_s30 = scalar_lea.hbm %s2428_s29, 1024 }
 0x35e   : > { %p1557_p4 = scmp.ne.s32.totalorder %s1205_s24, %s1556_s17  ;;  %p1561_p9 = scmp.lt.u32.totalorder %s1205_s24, %s2428_s29 }
 0x35f   : > { %p1562_p10 = scmp.lt.u32.totalorder %s1560_s30, %s1556_s17  ;;  %p1564_p12 = scmp.lt.u32.totalorder %s1556_s17, %s1205_s24 }
 0x360   : > { %p1558_p6 = pnand %p1557_p4, %p1787_p5 }
 0x361   : > { %p1563_p11 = por %p1562_p10, %p1561_p9 }
 0x362   : > { %p1559_p8 = pneg %p1558_p6 }
 0x363   : > { %p1565_p0 = por %p1564_p12, %p1563_p11 }
 0x365   : > { %p1566_p13 = pnand %p1565_p0, %p1559_p8 }
 0x367   : > { %1569 = shalt.err (!%p1566_p13)
}
 0x368   : > { %1433 = dma.vmem_to_hbm [thread:$0]  (%p1787_p5), %s2328_s26, 128, %s1205_s24, %s1188_s21  }
 0x369 PF: > { %s2429_s18 = sld [smem:[#allocation14_spill]]  ;;  %s2430_s22 = sld [smem:[#allocation9_spill]] }
 0x36f   : > { %p1439_p1 = scmp.ge.s32.totalorder %s2429_s18, 2  ;;  %s1231_s28 = sand.u32 1, %s2430_s22  }
 0x370   : > { %s1232_s19 = scalar_lea.sflag [#allocation7], %s1231_s28 }
 0x371   : > { %p1436_p2 = pnand %p1439_p1, %p1796_p7 }
 0x373   : > { %1611 = dma.done.wait (!%p1436_p2), %s1232_s19, 128  }
 0x374   : > { %1613 = vsyncadd (!%p1436_p2), %s1232_s19, 4294967168  ;;  %s23_s18 = sadd.s32 1, %s2429_s18   ;;  %s2432_s27 = sld [smem:[#allocation10_spill]] }
 0x375   : > { %p20_p3 = scmp.ge.s32.totalorder %s23_s18, 18   ;;  %s2433_s11 = sld [smem:[#allocation20_spill]] }
 0x376   : > { %s2434_s12 = sld [smem:[#allocation11_spill]]  ;;  %s2435_s13 = sld [smem:[#allocation12_spill]] }
 0x377   : > { %s2436_s14 = sld [smem:[#allocation13_spill]]  ;;  %s2437_s15 = sld [smem:[#allocation15_spill]] }
 0x378   : > { %s2438_s16 = sld [smem:[#allocation17_spill]]  ;;  %s2439_s17 = sld [smem:[#allocation19_spill]] }
 0x379   : > { %s2440_s30 = smov %s1620_s10  ;;  %22 = sbr.rel (!%p20_p3) target bundleno = 9 (0x9), region = 115 }
 0x37a   : > { %s2441_s10 = smov %s2432_s27 }
 0x380   :  { %1237 = vsyncpa [#allocation7], 1 }
 0x381   :  { %1239 = vsyncpa [#allocation7 + $0x1], 1 }

</bundles_post_ra>
